<compile_context>
chip_gen: v7x
topology: tpu7x:2x2x1
jax: 0.10.0
libtpu: 0.0.40
codegen_flags: <defaults>
</compile_context>

<pallas_src>
import functools

import jax
import jax.numpy as jnp
from jax.experimental import pallas as pl
from jax.experimental.pallas import tpu as pltpu


_COUT_PAD = 128                 # pad Cout to one full lane tile -> lane-dense stores
_STRIDES = (2, 2, 2, 2)
_PADS = (2, 1, 1, 1)
_KERNELS = (6, 4, 4, 4)


# ----------------------------- Pallas kernel --------------------------------

def _conv_block_kernel(p_ref, w_ref, o_ref, *, n, p_pad, p_valid, use_norm,
                       eps, neg_slope):
    """Fused conv-as-matmul + InstanceNorm2d + LeakyReLU for one block.

    p_ref: [N*P_pad, F]    bf16 im2col patches (batch folded into M; pad rows are 0)
    w_ref: [F, 128]        bf16 weight, feature order (kh, kw, cin); cout zero-padded
    o_ref: [N*P_pad, 128]  f32, lane-dense
    """
    y = jnp.dot(p_ref[...], w_ref[...], preferred_element_type=jnp.float32)
    if use_norm:
        c = y.shape[-1]
        # Per-sample view; P_pad % 8 == 0 so this reshape is tile-aligned.
        y3 = y.reshape(n, p_pad, c)
        inv_p = 1.0 / p_valid
        s1 = jnp.sum(y3, axis=1, keepdims=True)        # single pass: sum
        s2 = jnp.sum(y3 * y3, axis=1, keepdims=True)   #              sum of squares
        mean = s1 * inv_p
        # Biased variance + eps=1e-5 == nn.InstanceNorm2d(affine=False).
        var = jnp.maximum(s2 * inv_p - mean * mean, 0.0)
        y3 = (y3 - mean) * jax.lax.rsqrt(var + eps)    # rsqrt -> EUP slot
        y = y3.reshape(n * p_pad, c)
    # LeakyReLU(negative_slope=0.2)
    y = jnp.where(y >= 0.0, y, neg_slope * y)
    o_ref[...] = y.astype(o_ref.dtype)


# ------------------------------ JAX glue -------------------------------------

def _round_up(v, m):
    return -(-v // m) * m


def conv2d_block_nhwc(x_nhwc, w_prep, *, K, stride, padding, Cout, use_norm,
                      eps=1e-5, neg_slope=0.2):
    """Conv2dBlock(pad_type='zero', bias=False, norm in {'none','in'}, act='lrelu').

    x_nhwc: [N, H, W, Cin] f32;  w_prep: [K*K*Cin, 128] bf16 (prepared at init).
    Returns NHWC [N, OH, OW, Cout] f32.
    """
    N, H, W, Cin = x_nhwc.shape
    F = K * K * Cin
    assert w_prep.shape == (F, _COUT_PAD)

    xp = jnp.pad(x_nhwc, ((0, 0), (padding, padding), (padding, padding), (0, 0)))
    Hp, Wp = H + 2 * padding, W + 2 * padding
    OH = (Hp - K) // stride + 1
    OW = (Wp - K) // stride + 1
    P = OH * OW
    P_pad = _round_up(P, 8)

    # im2col in NHWC, feature order (kh, kw, cin) — matches the prepped weight.
    pieces = []
    for kh in range(K):
        for kw in range(K):
            pieces.append(
                xp[:, kh:kh + stride * OH:stride, kw:kw + stride * OW:stride, :])
    pat = jnp.concatenate(pieces, axis=-1)          # [N, OH, OW, K*K*Cin]
    pat = pat.reshape(N, P, F)
    if P_pad != P:
        pat = jnp.pad(pat, ((0, 0), (0, P_pad - P), (0, 0)))  # zero rows (ignored)
    pat = pat.reshape(N * P_pad, F).astype(jnp.bfloat16)      # bf16 MXU operands

    kernel = functools.partial(
        _conv_block_kernel, n=N, p_pad=P_pad, p_valid=P,
        use_norm=use_norm, eps=eps, neg_slope=neg_slope)

    out = pl.pallas_call(
        kernel,
        out_shape=jax.ShapeDtypeStruct((N * P_pad, _COUT_PAD), jnp.float32),
        in_specs=[pl.BlockSpec(memory_space=pltpu.MemorySpace.VMEM),
                  pl.BlockSpec(memory_space=pltpu.MemorySpace.VMEM)],
        out_specs=pl.BlockSpec(memory_space=pltpu.MemorySpace.VMEM),
    )(pat, w_prep)

    # Drop padded rows / channels, back to NHWC.
    out = out.reshape(N, P_pad, _COUT_PAD)[:, :P, :Cout]
    return out.reshape(N, OH, OW, Cout)


# --------------------------- FourBlocksCNN ------------------------------------

def _prep_weight(w):
    """[Cout, Cin, K, K] f32 -> [K*K*Cin, 128] bf16, feature order (kh, kw, cin)."""
    cout, cin, k, _ = w.shape
    w2 = jnp.transpose(w, (2, 3, 1, 0)).reshape(k * k * cin, cout)
    w2 = jnp.pad(w2, ((0, 0), (0, _COUT_PAD - cout)))
    return w2.astype(jnp.bfloat16)


def init_four_blocks_params(key, channels):
    """channels: (c0..c4); 4 conv weights (bias=False), prepped for the kernel."""
    params = []
    for i in range(4):
        key, sub = jax.random.split(key)
        cin, cout, k = channels[i], channels[i + 1], _KERNELS[i]
        fan_in = cin * k * k
        w = jax.random.normal(sub, (cout, cin, k, k), jnp.float32) / jnp.sqrt(fan_in)
        params.append(_prep_weight(w))       # hoisted reshape/pad/cast (per review)
    return params


def four_blocks_cnn(x_nchw, weights, channels):
    """feat_1: norm='none'; feat_2..4: norm='in'; all lrelu(0.2), bias=False."""
    x_nhwc = jnp.transpose(x_nchw, (0, 2, 3, 1))    # NHWC internally
    pads_eff = (_PADS[0], _PADS[1], _PADS[2], _PADS[2])   # original reuses pads[2] for feat_4
    use_norms = (False, True, True, True)
    feats = []
    h = x_nhwc
    for i in range(4):
        h = conv2d_block_nhwc(h, weights[i], K=_KERNELS[i], stride=_STRIDES[i],
                              padding=pads_eff[i], Cout=channels[i + 1],
                              use_norm=use_norms[i])
        feats.append(h)
    # Only the user-visible outputs are converted back to NCHW.
    return [x_nchw] + [jnp.transpose(f, (0, 3, 1, 2)) for f in feats]


# --------------------------- ListFourBlocksCNN --------------------------------

class ListFourBlocksCNNPallas:
    def __init__(self, net_conf, key):
        self.num_nets = net_conf['num_doms']
        self.num_out_per_net = net_conf['num_channels']
        # NOTE: the original PyTorch __init__ passes a temp_conf lacking 'channels'
        # (which would KeyError); we take the channel plan explicitly, with the
        # final channel count equal to num_out_per_net.
        channels = tuple(net_conf['channels'])
        assert channels[-1] == self.num_out_per_net
        self.channels = channels
        self.net_params = []
        for _ in range(self.num_nets):
            key, sub = jax.random.split(key)
            self.net_params.append(init_four_blocks_params(sub, channels))
        self.paras = jnp.zeros((self.num_nets, self.num_out_per_net), jnp.float32)
        self._fwd = jax.jit(four_blocks_cnn, static_argnums=2)

    def forward(self, phase, net_idx=None, x=None):
        if phase == 'train':
            return self.forward_train(x, net_idx)
        elif phase == 'test':
            return self.forward_test(net_idx)
        else:
            raise ValueError('Invalid phase!')

    def forward_train(self, x, net_idx=0):
        out = self._fwd(x, self.net_params[net_idx], self.channels)
        # TODO(synk): original code does `out.mean(dim=0)` on a Python list (invalid in
        # PyTorch); interpreted here as the per-channel mean of the last feature map
        # over batch+spatial, matching paras[net_idx]'s shape (num_out_per_net,).
        feat_mean = out[-1].mean(axis=(0, 2, 3))
        self.paras = self.paras.at[net_idx].set(
            self.paras[net_idx] * 0.95 + feat_mean)
        return out

    def forward_test(self, net_idx):
        if net_idx is not None:
            return self.paras[net_idx]
        return self.paras.mean(axis=0)


# ----------------------------------- main -------------------------------------

if __name__ == "__main__":
    key = jax.random.PRNGKey(0)
    k_x, k_p = jax.random.split(key)

    net_conf = {
        'num_doms': 2,
        'num_channels': 8,
        'channels': [4, 8, 16, 16, 8],   # c0..c4
    }
    model = ListFourBlocksCNNPallas(net_conf, k_p)

    # NCHW input; 32x32 keeps all four downsampled feature maps non-degenerate.
    x = jax.random.normal(k_x, (2, 4, 32, 32), jnp.float32)

    outs = model.forward('train', net_idx=0, x=x)
    outs = jax.block_until_ready(outs)
    paras_row = jax.block_until_ready(model.forward('test', net_idx=0))
    paras_mean = jax.block_until_ready(model.forward('test', net_idx=None))

    expected_shapes = [(2, 4, 32, 32), (2, 8, 16, 16), (2, 16, 8, 8),
                       (2, 16, 4, 4), (2, 8, 2, 2)]
    assert [tuple(o.shape) for o in outs] == expected_shapes
    assert paras_row.shape == (8,) and paras_mean.shape == (8,)

    print("KERNEL_OK")
</pallas_src>

<mosaic_0001>
module attributes {stable_mosaic.version = 11 : i64} {
  func.func @_conv_block_kernel(%arg0: memref<512x144xbf16, #tpu.memory_space<vmem>>, %arg1: memref<144x128xbf16, #tpu.memory_space<vmem>>, %arg2: memref<512x128xf32, #tpu.memory_space<vmem>>) attributes {dimension_semantics = [], scalar_prefetch = 0 : i64, scratch_operands = 0 : i64, tpu.core_type = #tpu.core_type<tc>} {
    %c0 = arith.constant 0 : index
    %c0_0 = arith.constant 0 : index
    %0 = vector.load %arg0[%c0, %c0_0] : memref<512x144xbf16, #tpu.memory_space<vmem>>, vector<512x144xbf16>
    %c0_1 = arith.constant 0 : index
    %c0_2 = arith.constant 0 : index
    %1 = vector.load %arg1[%c0_1, %c0_2] : memref<144x128xbf16, #tpu.memory_space<vmem>>, vector<144x128xbf16>
    %cst = arith.constant dense<0.000000e+00> : vector<512x128xf32>
    %2 = tpu.matmul %0, %1, %cst {dimension_numbers = #tpu.dot_dimension_numbers<[1], [0], [0], [1], [0, 0, 1, 1], [], []>} : vector<512x144xbf16>, vector<144x128xbf16>, vector<512x128xf32> -> vector<512x128xf32>
    %cst_3 = arith.constant 0.000000e+00 : f32
    %3 = vector.broadcast %cst_3 : f32 to vector<512x128xf32>
    %4 = arith.cmpf oge, %2, %3 : vector<512x128xf32>
    %cst_4 = arith.constant 2.000000e-01 : f32
    %5 = vector.broadcast %cst_4 : f32 to vector<512x128xf32>
    %6 = arith.mulf %5, %2 : vector<512x128xf32>
    %7 = arith.select %4, %2, %6 : vector<512x128xi1>, vector<512x128xf32>
    %c0_5 = arith.constant 0 : index
    %c0_6 = arith.constant 0 : index
    %8 = vector.load %arg2[%c0_5, %c0_6] : memref<512x128xf32, #tpu.memory_space<vmem>>, vector<512x128xf32>
    tpu.vector_store %arg2[%c0_5, %c0_6], %7 {strides = array<i32>} : memref<512x128xf32, #tpu.memory_space<vmem>>, vector<512x128xf32>,
    return
  }
}

module attributes {stable_mosaic.version = 11 : i64} {
  func.func @_conv_block_kernel(%arg0: memref<128x128xbf16, #tpu.memory_space<vmem>>, %arg1: memref<128x128xbf16, #tpu.memory_space<vmem>>, %arg2: memref<128x128xf32, #tpu.memory_space<vmem>>) attributes {dimension_semantics = [], scalar_prefetch = 0 : i64, scratch_operands = 0 : i64, tpu.core_type = #tpu.core_type<tc>} {
    %c0 = arith.constant 0 : index
    %c0_0 = arith.constant 0 : index
    %0 = vector.load %arg0[%c0, %c0_0] : memref<128x128xbf16, #tpu.memory_space<vmem>>, vector<128x128xbf16>
    %c0_1 = arith.constant 0 : index
    %c0_2 = arith.constant 0 : index
    %1 = vector.load %arg1[%c0_1, %c0_2] : memref<128x128xbf16, #tpu.memory_space<vmem>>, vector<128x128xbf16>
    %cst = arith.constant dense<0.000000e+00> : vector<128x128xf32>
    %2 = tpu.matmul %0, %1, %cst {dimension_numbers = #tpu.dot_dimension_numbers<[1], [0], [0], [1], [0, 0, 1, 1], [], []>} : vector<128x128xbf16>, vector<128x128xbf16>, vector<128x128xf32> -> vector<128x128xf32>
    %3 = vector.shape_cast %2 : vector<128x128xf32> to vector<2x64x128xf32>
    %cst_3 = arith.constant dense<0.000000e+00> : vector<2x128xf32>
    %4 = vector.multi_reduction <add>, %3, %cst_3 [1] : vector<2x64x128xf32> to vector<2x128xf32>
    %5 = vector.shape_cast %4 : vector<2x128xf32> to vector<2x1x128xf32>
    %6 = arith.mulf %3, %3 : vector<2x64x128xf32>
    %cst_4 = arith.constant dense<0.000000e+00> : vector<2x128xf32>
    %7 = vector.multi_reduction <add>, %6, %cst_4 [1] : vector<2x64x128xf32> to vector<2x128xf32>
    %8 = vector.shape_cast %7 : vector<2x128xf32> to vector<2x1x128xf32>
    %cst_5 = arith.constant 1.562500e-02 : f32
    %9 = vector.broadcast %cst_5 : f32 to vector<2x1x128xf32>
    %10 = arith.mulf %5, %9 : vector<2x1x128xf32>
    %cst_6 = arith.constant 1.562500e-02 : f32
    %11 = vector.broadcast %cst_6 : f32 to vector<2x1x128xf32>
    %12 = arith.mulf %8, %11 : vector<2x1x128xf32>
    %13 = arith.mulf %10, %10 : vector<2x1x128xf32>
    %14 = arith.subf %12, %13 : vector<2x1x128xf32>
    %cst_7 = arith.constant 0.000000e+00 : f32
    %15 = vector.broadcast %cst_7 : f32 to vector<2x1x128xf32>
    %16 = arith.maximumf %14, %15 : vector<2x1x128xf32>
    %17 = vector.broadcast %10 : vector<2x1x128xf32> to vector<2x64x128xf32>
    %18 = arith.subf %3, %17 : vector<2x64x128xf32>
    %cst_8 = arith.constant 9.99999974E-6 : f32
    %19 = vector.broadcast %cst_8 : f32 to vector<2x1x128xf32>
    %20 = arith.addf %16, %19 : vector<2x1x128xf32>
    %21 = math.rsqrt %20 : vector<2x1x128xf32>
    %22 = vector.broadcast %21 : vector<2x1x128xf32> to vector<2x64x128xf32>
    %23 = arith.mulf %18, %22 : vector<2x64x128xf32>
    %24 = vector.shape_cast %23 : vector<2x64x128xf32> to vector<128x128xf32>
    %cst_9 = arith.constant 0.000000e+00 : f32
    %25 = vector.broadcast %cst_9 : f32 to vector<128x128xf32>
    %26 = arith.cmpf oge, %24, %25 : vector<128x128xf32>
    %cst_10 = arith.constant 2.000000e-01 : f32
    %27 = vector.broadcast %cst_10 : f32 to vector<128x128xf32>
    %28 = arith.mulf %27, %24 : vector<128x128xf32>
    %29 = arith.select %26, %24, %28 : vector<128x128xi1>, vector<128x128xf32>
    %c0_11 = arith.constant 0 : index
    %c0_12 = arith.constant 0 : index
    %30 = vector.load %arg2[%c0_11, %c0_12] : memref<128x128xf32, #tpu.memory_space<vmem>>, vector<128x128xf32>
    tpu.vector_store %arg2[%c0_11, %c0_12], %29 {strides = array<i32>} : memref<128x128xf32, #tpu.memory_space<vmem>>, vector<128x128xf32>,
    return
  }
}

module attributes {stable_mosaic.version = 11 : i64} {
  func.func @_conv_block_kernel(%arg0: memref<32x256xbf16, #tpu.memory_space<vmem>>, %arg1: memref<256x128xbf16, #tpu.memory_space<vmem>>, %arg2: memref<32x128xf32, #tpu.memory_space<vmem>>) attributes {dimension_semantics = [], scalar_prefetch = 0 : i64, scratch_operands = 0 : i64, tpu.core_type = #tpu.core_type<tc>} {
    %c0 = arith.constant 0 : index
    %c0_0 = arith.constant 0 : index
    %0 = vector.load %arg0[%c0, %c0_0] : memref<32x256xbf16, #tpu.memory_space<vmem>>, vector<32x256xbf16>
    %c0_1 = arith.constant 0 : index
    %c0_2 = arith.constant 0 : index
    %1 = vector.load %arg1[%c0_1, %c0_2] : memref<256x128xbf16, #tpu.memory_space<vmem>>, vector<256x128xbf16>
    %cst = arith.constant dense<0.000000e+00> : vector<32x128xf32>
    %2 = tpu.matmul %0, %1, %cst {dimension_numbers = #tpu.dot_dimension_numbers<[1], [0], [0], [1], [0, 0, 1, 1], [], []>} : vector<32x256xbf16>, vector<256x128xbf16>, vector<32x128xf32> -> vector<32x128xf32>
    %3 = vector.shape_cast %2 : vector<32x128xf32> to vector<2x16x128xf32>
    %cst_3 = arith.constant dense<0.000000e+00> : vector<2x128xf32>
    %4 = vector.multi_reduction <add>, %3, %cst_3 [1] : vector<2x16x128xf32> to vector<2x128xf32>
    %5 = vector.shape_cast %4 : vector<2x128xf32> to vector<2x1x128xf32>
    %6 = arith.mulf %3, %3 : vector<2x16x128xf32>
    %cst_4 = arith.constant dense<0.000000e+00> : vector<2x128xf32>
    %7 = vector.multi_reduction <add>, %6, %cst_4 [1] : vector<2x16x128xf32> to vector<2x128xf32>
    %8 = vector.shape_cast %7 : vector<2x128xf32> to vector<2x1x128xf32>
    %cst_5 = arith.constant 6.250000e-02 : f32
    %9 = vector.broadcast %cst_5 : f32 to vector<2x1x128xf32>
    %10 = arith.mulf %5, %9 : vector<2x1x128xf32>
    %cst_6 = arith.constant 6.250000e-02 : f32
    %11 = vector.broadcast %cst_6 : f32 to vector<2x1x128xf32>
    %12 = arith.mulf %8, %11 : vector<2x1x128xf32>
    %13 = arith.mulf %10, %10 : vector<2x1x128xf32>
    %14 = arith.subf %12, %13 : vector<2x1x128xf32>
    %cst_7 = arith.constant 0.000000e+00 : f32
    %15 = vector.broadcast %cst_7 : f32 to vector<2x1x128xf32>
    %16 = arith.maximumf %14, %15 : vector<2x1x128xf32>
    %17 = vector.broadcast %10 : vector<2x1x128xf32> to vector<2x16x128xf32>
    %18 = arith.subf %3, %17 : vector<2x16x128xf32>
    %cst_8 = arith.constant 9.99999974E-6 : f32
    %19 = vector.broadcast %cst_8 : f32 to vector<2x1x128xf32>
    %20 = arith.addf %16, %19 : vector<2x1x128xf32>
    %21 = math.rsqrt %20 : vector<2x1x128xf32>
    %22 = vector.broadcast %21 : vector<2x1x128xf32> to vector<2x16x128xf32>
    %23 = arith.mulf %18, %22 : vector<2x16x128xf32>
    %24 = vector.shape_cast %23 : vector<2x16x128xf32> to vector<32x128xf32>
    %cst_9 = arith.constant 0.000000e+00 : f32
    %25 = vector.broadcast %cst_9 : f32 to vector<32x128xf32>
    %26 = arith.cmpf oge, %24, %25 : vector<32x128xf32>
    %cst_10 = arith.constant 2.000000e-01 : f32
    %27 = vector.broadcast %cst_10 : f32 to vector<32x128xf32>
    %28 = arith.mulf %27, %24 : vector<32x128xf32>
    %29 = arith.select %26, %24, %28 : vector<32x128xi1>, vector<32x128xf32>
    %c0_11 = arith.constant 0 : index
    %c0_12 = arith.constant 0 : index
    %30 = vector.load %arg2[%c0_11, %c0_12] : memref<32x128xf32, #tpu.memory_space<vmem>>, vector<32x128xf32>
    tpu.vector_store %arg2[%c0_11, %c0_12], %29 {strides = array<i32>} : memref<32x128xf32, #tpu.memory_space<vmem>>, vector<32x128xf32>,
    return
  }
}

module attributes {stable_mosaic.version = 11 : i64} {
  func.func @_conv_block_kernel(%arg0: memref<16x256xbf16, #tpu.memory_space<vmem>>, %arg1: memref<256x128xbf16, #tpu.memory_space<vmem>>, %arg2: memref<16x128xf32, #tpu.memory_space<vmem>>) attributes {dimension_semantics = [], scalar_prefetch = 0 : i64, scratch_operands = 0 : i64, tpu.core_type = #tpu.core_type<tc>} {
    %c0 = arith.constant 0 : index
    %c0_0 = arith.constant 0 : index
    %0 = vector.load %arg0[%c0, %c0_0] : memref<16x256xbf16, #tpu.memory_space<vmem>>, vector<16x256xbf16>
    %c0_1 = arith.constant 0 : index
    %c0_2 = arith.constant 0 : index
    %1 = vector.load %arg1[%c0_1, %c0_2] : memref<256x128xbf16, #tpu.memory_space<vmem>>, vector<256x128xbf16>
    %cst = arith.constant dense<0.000000e+00> : vector<16x128xf32>
    %2 = tpu.matmul %0, %1, %cst {dimension_numbers = #tpu.dot_dimension_numbers<[1], [0], [0], [1], [0, 0, 1, 1], [], []>} : vector<16x256xbf16>, vector<256x128xbf16>, vector<16x128xf32> -> vector<16x128xf32>
    %3 = vector.shape_cast %2 : vector<16x128xf32> to vector<2x8x128xf32>
    %cst_3 = arith.constant dense<0.000000e+00> : vector<2x128xf32>
    %4 = vector.multi_reduction <add>, %3, %cst_3 [1] : vector<2x8x128xf32> to vector<2x128xf32>
    %5 = vector.shape_cast %4 : vector<2x128xf32> to vector<2x1x128xf32>
    %6 = arith.mulf %3, %3 : vector<2x8x128xf32>
    %cst_4 = arith.constant dense<0.000000e+00> : vector<2x128xf32>
    %7 = vector.multi_reduction <add>, %6, %cst_4 [1] : vector<2x8x128xf32> to vector<2x128xf32>
    %8 = vector.shape_cast %7 : vector<2x128xf32> to vector<2x1x128xf32>
    %cst_5 = arith.constant 2.500000e-01 : f32
    %9 = vector.broadcast %cst_5 : f32 to vector<2x1x128xf32>
    %10 = arith.mulf %5, %9 : vector<2x1x128xf32>
    %cst_6 = arith.constant 2.500000e-01 : f32
    %11 = vector.broadcast %cst_6 : f32 to vector<2x1x128xf32>
    %12 = arith.mulf %8, %11 : vector<2x1x128xf32>
    %13 = arith.mulf %10, %10 : vector<2x1x128xf32>
    %14 = arith.subf %12, %13 : vector<2x1x128xf32>
    %cst_7 = arith.constant 0.000000e+00 : f32
    %15 = vector.broadcast %cst_7 : f32 to vector<2x1x128xf32>
    %16 = arith.maximumf %14, %15 : vector<2x1x128xf32>
    %17 = vector.broadcast %10 : vector<2x1x128xf32> to vector<2x8x128xf32>
    %18 = arith.subf %3, %17 : vector<2x8x128xf32>
    %cst_8 = arith.constant 9.99999974E-6 : f32
    %19 = vector.broadcast %cst_8 : f32 to vector<2x1x128xf32>
    %20 = arith.addf %16, %19 : vector<2x1x128xf32>
    %21 = math.rsqrt %20 : vector<2x1x128xf32>
    %22 = vector.broadcast %21 : vector<2x1x128xf32> to vector<2x8x128xf32>
    %23 = arith.mulf %18, %22 : vector<2x8x128xf32>
    %24 = vector.shape_cast %23 : vector<2x8x128xf32> to vector<16x128xf32>
    %cst_9 = arith.constant 0.000000e+00 : f32
    %25 = vector.broadcast %cst_9 : f32 to vector<16x128xf32>
    %26 = arith.cmpf oge, %24, %25 : vector<16x128xf32>
    %cst_10 = arith.constant 2.000000e-01 : f32
    %27 = vector.broadcast %cst_10 : f32 to vector<16x128xf32>
    %28 = arith.mulf %27, %24 : vector<16x128xf32>
    %29 = arith.select %26, %24, %28 : vector<16x128xi1>, vector<16x128xf32>
    %c0_11 = arith.constant 0 : index
    %c0_12 = arith.constant 0 : index
    %30 = vector.load %arg2[%c0_11, %c0_12] : memref<16x128xf32, #tpu.memory_space<vmem>>, vector<16x128xf32>
    tpu.vector_store %arg2[%c0_11, %c0_12], %29 {strides = array<i32>} : memref<16x128xf32, #tpu.memory_space<vmem>>, vector<16x128xf32>,
    return
  }
}

</mosaic_0001>

<bundles_post_ra>
// kernel: four_blocks_cnn.4
= control target key start
LH: loop header
LB: loop body
LE: loop exit
PB: predicated region body
PF: predicated region fallthrough
CT: control target
= control target key end

     0   :  { %v1311_v0 = vmov 0   ;;  %vm436_vm0 = vcmask 130048   ;;  %s1770_s1 = inlined_call_operand.vmem [shape: bf16[144,128], index: 1, kind: input, shape index: {}]   ;;  %s1771_s0 = inlined_call_operand.vmem [shape: bf16[512,144], index: 0, kind: input, shape index: {}]   ;;  %s1772_s2 = inlined_call_operand.vmem [shape: f32[512,128], index: 2, kind: output, shape index: {}]  }
   0x1   :  { %533 = vmatprep.subr.bf16.mxu0 %v1311_v0  ;;  %1187 = vmatprep.subr.bf16.mxu1 %v1311_v0  ;;  %v1206_v1 = vld [vmem:[%s1770_s1] sm:$0xff]   ;;  %v1207_v2 = vld [vmem:[%s1770_s1 + $0x8] sm:$0xff]   ;;  %v1208_v3 = vld [vmem:[%s1770_s1 + $0x10] sm:$0xff]  }
   0x2   :  { %534 = vmatpush1.bf16.msra.mxu0 %v1206_v1  ;;  %1196 = vmatpush1.bf16.msra.mxu1 %v1206_v1  ;;  %v1209_v4 = vld [vmem:[%s1770_s1 + $0x18] sm:$0xff]   ;;  %v1217_v5 = vld [vmem:[%s1771_s0 + $0x4] ss:$8 sps:$4 sm:$0xff]   ;;  %v1212_v9 = vld [vmem:[%s1770_s1 + $0x30] sm:$0xff]  }
   0x3   :  { %535 = vmatprep.subr.bf16.mxu0 %v1311_v0  ;;  %1188 = vmatprep.subr.bf16.mxu1 %v1311_v0  ;;  %v1220_v6 = vld [vmem:[%s1771_s0 + $0x104] ss:$8 sps:$4 sm:$0xff]   ;;  %v1213_v10 = vld [vmem:[%s1770_s1 + $0x38] sm:$0xff]   ;;  %v1215_v12 = vld [vmem:[%s1771_s0] ss:$8 sps:$4 sm:$0xff]  }
   0x4   :  { %1155 = vmatprep.mubr.msk.bf16.mxu0 %vm436_vm0, %v1217_v5  ;;  %1171 = vmatprep.mubr.msk.bf16.mxu1 %vm436_vm0, %v1220_v6  ;;  %v1210_v7 = vld [vmem:[%s1770_s1 + $0x20] sm:$0xff]   ;;  %v1211_v8 = vld [vmem:[%s1770_s1 + $0x28] sm:$0xff]   ;;  %v1221_v14 = vld [vmem:[%s1771_s0 + $0x14] ss:$8 sps:$4 sm:$0xff]  }
   0x5   :  { %v1214_v11 = vld [vmem:[%s1770_s1 + $0x40] sm:$0xff]   ;;  %v1223_v15 = vld [vmem:[%s1771_s0 + $0x114] ss:$8 sps:$4 sm:$0xff]   ;;  %v1225_v16 = vld [vmem:[%s1771_s0 + $0x10] ss:$8 sps:$4 sm:$0xff]  }
   0x6   :  { %536 = vmatpush1.bf16.msra.mxu0 %v1207_v2  ;;  %1197 = vmatpush1.bf16.msra.mxu1 %v1207_v2  ;;  %v1218_v13 = vld [vmem:[%s1771_s0 + $0x100] ss:$8 sps:$4 sm:$0xff]   ;;  %v1226_v17 = vld [vmem:[%s1771_s0 + $0x110] ss:$8 sps:$4 sm:$0xff]   ;;  %v1227_v18 = vld [vmem:[%s1771_s0 + $0x24] ss:$8 sps:$4 sm:$0xff]  }
   0x7   :  { %537 = vmatprep.subr.bf16.mxu0 %v1311_v0  ;;  %1189 = vmatprep.subr.bf16.mxu1 %v1311_v0  ;;  %v1229_v19 = vld [vmem:[%s1771_s0 + $0x124] ss:$8 sps:$4 sm:$0xff]   ;;  %v1231_v20 = vld [vmem:[%s1771_s0 + $0x20] ss:$8 sps:$4 sm:$0xff]   ;;  %v1233_v22 = vld [vmem:[%s1771_s0 + $0x34] ss:$8 sps:$4 sm:$0xff]  }
   0x8   :  { %v1232_v21 = vld [vmem:[%s1771_s0 + $0x120] ss:$8 sps:$4 sm:$0xff]   ;;  %v1235_v23 = vld [vmem:[%s1771_s0 + $0x134] ss:$8 sps:$4 sm:$0xff]   ;;  %v1237_v24 = vld [vmem:[%s1771_s0 + $0x30] ss:$8 sps:$4 sm:$0xff]  }
   0x9   :  { %v1238_v25 = vld [vmem:[%s1771_s0 + $0x130] ss:$8 sps:$4 sm:$0xff]   ;;  %v1239_v26 = vld [vmem:[%s1771_s0 + $0x44] ss:$8 sps:$4 sm:$0xff]   ;;  %v1243_v28 = vld [vmem:[%s1771_s0 + $0x40] ss:$8 sps:$4 sm:$0xff]  }
   0xa   :  { %538 = vmatpush1.bf16.msra.mxu0 %v1208_v3  ;;  %1198 = vmatpush1.bf16.msra.mxu1 %v1208_v3  ;;  %v1241_v27 = vld [vmem:[%s1771_s0 + $0x144] ss:$8 sps:$4 sm:$0xff]   ;;  %v1244_v29 = vld [vmem:[%s1771_s0 + $0x140] ss:$8 sps:$4 sm:$0xff]   ;;  %v1245_v30 = vld [vmem:[%s1771_s0 + $0x54] ss:$8 sps:$4 sm:$0xff]  }
   0xb   :  { %539 = vmatprep.subr.bf16.mxu0 %v1311_v0  ;;  %1190 = vmatprep.subr.bf16.mxu1 %v1311_v0  ;;  %v1247_v31 = vld [vmem:[%s1771_s0 + $0x154] ss:$8 sps:$4 sm:$0xff]   ;;  %v1249_v32 = vld [vmem:[%s1771_s0 + $0x50] ss:$8 sps:$4 sm:$0xff]   ;;  %v1251_v34 = vld [vmem:[%s1771_s0 + $0x64] ss:$8 sps:$4 sm:$0xff]  }
   0xc   :  { %v1250_v33 = vld [vmem:[%s1771_s0 + $0x150] ss:$8 sps:$4 sm:$0xff]   ;;  %v1253_v35 = vld [vmem:[%s1771_s0 + $0x164] ss:$8 sps:$4 sm:$0xff]   ;;  %v1255_v36 = vld [vmem:[%s1771_s0 + $0x60] ss:$8 sps:$4 sm:$0xff]  }
   0xd   :  { %v1256_v37 = vld [vmem:[%s1771_s0 + $0x160] ss:$8 sps:$4 sm:$0xff]   ;;  %v1257_v38 = vld [vmem:[%s1771_s0 + $0x74] ss:$8 sps:$4 sm:$0xff]   ;;  %v1261_v40 = vld [vmem:[%s1771_s0 + $0x70] ss:$8 sps:$4 sm:$0xff]  }
   0xe   :  { %540 = vmatpush1.bf16.msra.mxu0 %v1209_v4  ;;  %1199 = vmatpush1.bf16.msra.mxu1 %v1209_v4  ;;  %v1259_v39 = vld [vmem:[%s1771_s0 + $0x174] ss:$8 sps:$4 sm:$0xff]   ;;  %v1262_v41 = vld [vmem:[%s1771_s0 + $0x170] ss:$8 sps:$4 sm:$0xff]   ;;  %v1263_v42 = vld [vmem:[%s1771_s0 + $0x84] ss:$8 sps:$4 sm:$0xff]  }
   0xf   :  { %541 = vmatprep.subr.bf16.mxu0 %v1311_v0  ;;  %1191 = vmatprep.subr.bf16.mxu1 %v1311_v0  ;;  %v1265_v43 = vld [vmem:[%s1771_s0 + $0x184] ss:$8 sps:$4 sm:$0xff]   ;;  %v1267_v44 = vld [vmem:[%s1771_s0 + $0x80] ss:$8 sps:$4 sm:$0xff]   ;;  %v1269_v46 = vld [vmem:[%s1771_s0 + $0x94] ss:$8 sps:$4 sm:$0xff]  }
  0x10   :  { %v1268_v45 = vld [vmem:[%s1771_s0 + $0x180] ss:$8 sps:$4 sm:$0xff]   ;;  %v1271_v47 = vld [vmem:[%s1771_s0 + $0x194] ss:$8 sps:$4 sm:$0xff]   ;;  %v1273_v48 = vld [vmem:[%s1771_s0 + $0x90] ss:$8 sps:$4 sm:$0xff]  }
  0x11   :  { %v1274_v49 = vld [vmem:[%s1771_s0 + $0x190] ss:$8 sps:$4 sm:$0xff]   ;;  %v1275_v50 = vld [vmem:[%s1771_s0 + $0xa4] ss:$8 sps:$4 sm:$0xff]   ;;  %v1279_v52 = vld [vmem:[%s1771_s0 + $0xa0] ss:$8 sps:$4 sm:$0xff]  }
  0x12   :  { %542 = vmatpush1.bf16.msra.mxu0 %v1210_v7  ;;  %1200 = vmatpush1.bf16.msra.mxu1 %v1210_v7  ;;  %v1277_v51 = vld [vmem:[%s1771_s0 + $0x1a4] ss:$8 sps:$4 sm:$0xff]   ;;  %v1280_v53 = vld [vmem:[%s1771_s0 + $0x1a0] ss:$8 sps:$4 sm:$0xff]   ;;  %v1281_v54 = vld [vmem:[%s1771_s0 + $0xb4] ss:$8 sps:$4 sm:$0xff]  }
  0x13   :  { %543 = vmatprep.subr.bf16.mxu0 %v1311_v0  ;;  %1192 = vmatprep.subr.bf16.mxu1 %v1311_v0  ;;  %v1283_v55 = vld [vmem:[%s1771_s0 + $0x1b4] ss:$8 sps:$4 sm:$0xff]   ;;  %v1285_v56 = vld [vmem:[%s1771_s0 + $0xb0] ss:$8 sps:$4 sm:$0xff]   ;;  %v1287_v58 = vld [vmem:[%s1771_s0 + $0xc4] ss:$8 sps:$4 sm:$0xff]  }
  0x14   :  { %v1286_v57 = vld [vmem:[%s1771_s0 + $0x1b0] ss:$8 sps:$4 sm:$0xff]   ;;  %v1289_v59 = vld [vmem:[%s1771_s0 + $0x1c4] ss:$8 sps:$4 sm:$0xff]   ;;  %v1291_v60 = vld [vmem:[%s1771_s0 + $0xc0] ss:$8 sps:$4 sm:$0xff]  }
  0x15   :  { %v1292_v61 = vld [vmem:[%s1771_s0 + $0x1c0] ss:$8 sps:$4 sm:$0xff]   ;;  %v1293_v62 = vld [vmem:[%s1771_s0 + $0xd4] ss:$8 sps:$4 sm:$0xff]   ;;  %v1298_v1 = vld [vmem:[%s1771_s0 + $0x1d0] ss:$8 sps:$4 sm:$0xff]  }
  0x16   :  { %544 = vmatpush1.bf16.msra.mxu0 %v1211_v8  ;;  %1201 = vmatpush1.bf16.msra.mxu1 %v1211_v8  ;;  %v1295_v63 = vld [vmem:[%s1771_s0 + $0x1d4] ss:$8 sps:$4 sm:$0xff]   ;;  %v1299_v2 = vld [vmem:[%s1771_s0 + $0xe4] ss:$8 sps:$4 sm:$0xff]   ;;  %v1303_v4 = vld [vmem:[%s1771_s0 + $0xe0] ss:$8 sps:$4 sm:$0xff]  }
  0x17   :  { %545 = vmatprep.subr.bf16.mxu0 %v1311_v0  ;;  %1193 = vmatprep.subr.bf16.mxu1 %v1311_v0  ;;  %v1301_v3 = vld [vmem:[%s1771_s0 + $0x1e4] ss:$8 sps:$4 sm:$0xff]   ;;  %v1304_v5 = vld [vmem:[%s1771_s0 + $0x1e0] ss:$8 sps:$4 sm:$0xff]   ;;  %v1305_v6 = vld [vmem:[%s1771_s0 + $0xf4] ss:$8 sps:$4 sm:$0xff]  }
  0x18   :  { %v1307_v7 = vld [vmem:[%s1771_s0 + $0x1f4] ss:$8 sps:$4 sm:$0xff]   ;;  %v1309_v8 = vld [vmem:[%s1771_s0 + $0xf0] ss:$8 sps:$4 sm:$0xff]  }
  0x1a   :  { %546 = vmatpush1.bf16.msra.mxu0 %v1212_v9  ;;  %1202 = vmatpush1.bf16.msra.mxu1 %v1212_v9  ;;  %v1310_v9 = vld [vmem:[%s1771_s0 + $0x1f0] ss:$8 sps:$4 sm:$0xff]  }
  0x1b   :  { %547 = vmatprep.subr.bf16.mxu0 %v1311_v0  ;;  %1194 = vmatprep.subr.bf16.mxu1 %v1311_v0 }
  0x1e   :  { %548 = vmatpush1.bf16.msra.mxu0 %v1213_v10  ;;  %1203 = vmatpush1.bf16.msra.mxu1 %v1213_v10 }
  0x1f   :  { %549 = vmatprep.subr.bf16.mxu0 %v1311_v0  ;;  %1195 = vmatprep.subr.bf16.mxu1 %v1311_v0  ;;  %v1297_v0 = vld [vmem:[%s1771_s0 + $0xd0] ss:$8 sps:$4 sm:$0xff]  }
  0x22   :  { %550 = vmatpush1.bf16.msra.mxu0 %v1214_v11  ;;  %1204 = vmatpush1.bf16.msra.mxu1 %v1214_v11 }
  0x25   :  { %566 = vmatmul.mubr.bf16.vlgmr.msra.gmra.mrb[0].mxu0 %v1215_v12  ;;  %694 = vmatmul.mubr.bf16.vlgmr.msra.gmra.mrb[0].mxu1 %v1218_v13 }
  0x26   :  { %1156 = vmatprep.mubr.msk.bf16.mxu0 %vm436_vm0, %v1221_v14  ;;  %1172 = vmatprep.mubr.msk.bf16.mxu1 %vm436_vm0, %v1223_v15 }
  0x2d   :  { %574 = vmatmul.mubr.bf16.gmra.mrb[4].mxu0 %v1225_v16  ;;  %702 = vmatmul.mubr.bf16.gmra.mrb[4].mxu1 %v1226_v17 }
  0x2e   :  { %1157 = vmatprep.mubr.msk.bf16.mxu0 %vm436_vm0, %v1227_v18  ;;  %1173 = vmatprep.mubr.msk.bf16.mxu1 %vm436_vm0, %v1229_v19 }
  0x35   :  { %582 = vmatmul.mubr.bf16.gmra.mrb[8].mxu0 %v1231_v20  ;;  %710 = vmatmul.mubr.bf16.gmra.mrb[8].mxu1 %v1232_v21 }
  0x36   :  { %1158 = vmatprep.mubr.msk.bf16.mxu0 %vm436_vm0, %v1233_v22  ;;  %1174 = vmatprep.mubr.msk.bf16.mxu1 %vm436_vm0, %v1235_v23 }
  0x3d   :  { %590 = vmatmul.mubr.bf16.gmra.mrb[12].mxu0 %v1237_v24  ;;  %718 = vmatmul.mubr.bf16.gmra.mrb[12].mxu1 %v1238_v25 }
  0x3e   :  { %1159 = vmatprep.mubr.msk.bf16.mxu0 %vm436_vm0, %v1239_v26  ;;  %1175 = vmatprep.mubr.msk.bf16.mxu1 %vm436_vm0, %v1241_v27 }
  0x45   :  { %598 = vmatmul.mubr.bf16.gmra.mrb[16].mxu0 %v1243_v28  ;;  %726 = vmatmul.mubr.bf16.gmra.mrb[16].mxu1 %v1244_v29 }
  0x46   :  { %1160 = vmatprep.mubr.msk.bf16.mxu0 %vm436_vm0, %v1245_v30  ;;  %1176 = vmatprep.mubr.msk.bf16.mxu1 %vm436_vm0, %v1247_v31 }
  0x4d   :  { %606 = vmatmul.mubr.bf16.gmra.mrb[20].mxu0 %v1249_v32  ;;  %734 = vmatmul.mubr.bf16.gmra.mrb[20].mxu1 %v1250_v33 }
  0x4e   :  { %1161 = vmatprep.mubr.msk.bf16.mxu0 %vm436_vm0, %v1251_v34  ;;  %1177 = vmatprep.mubr.msk.bf16.mxu1 %vm436_vm0, %v1253_v35 }
  0x55   :  { %614 = vmatmul.mubr.bf16.gmra.mrb[24].mxu0 %v1255_v36  ;;  %742 = vmatmul.mubr.bf16.gmra.mrb[24].mxu1 %v1256_v37 }
  0x56   :  { %1162 = vmatprep.mubr.msk.bf16.mxu0 %vm436_vm0, %v1257_v38  ;;  %1178 = vmatprep.mubr.msk.bf16.mxu1 %vm436_vm0, %v1259_v39 }
  0x5d   :  { %622 = vmatmul.mubr.bf16.gmra.mrb[28].mxu0 %v1261_v40  ;;  %750 = vmatmul.mubr.bf16.gmra.mrb[28].mxu1 %v1262_v41 }
  0x5e   :  { %1163 = vmatprep.mubr.msk.bf16.mxu0 %vm436_vm0, %v1263_v42  ;;  %1179 = vmatprep.mubr.msk.bf16.mxu1 %vm436_vm0, %v1265_v43 }
  0x65   :  { %630 = vmatmul.mubr.bf16.gmra.mrb[32].mxu0 %v1267_v44  ;;  %758 = vmatmul.mubr.bf16.gmra.mrb[32].mxu1 %v1268_v45 }
  0x66   :  { %1164 = vmatprep.mubr.msk.bf16.mxu0 %vm436_vm0, %v1269_v46  ;;  %1180 = vmatprep.mubr.msk.bf16.mxu1 %vm436_vm0, %v1271_v47 }
  0x6d   :  { %638 = vmatmul.mubr.bf16.gmra.mrb[36].mxu0 %v1273_v48  ;;  %766 = vmatmul.mubr.bf16.gmra.mrb[36].mxu1 %v1274_v49 }
  0x6e   :  { %1165 = vmatprep.mubr.msk.bf16.mxu0 %vm436_vm0, %v1275_v50  ;;  %1181 = vmatprep.mubr.msk.bf16.mxu1 %vm436_vm0, %v1277_v51 }
  0x75   :  { %646 = vmatmul.mubr.bf16.gmra.mrb[40].mxu0 %v1279_v52  ;;  %774 = vmatmul.mubr.bf16.gmra.mrb[40].mxu1 %v1280_v53 }
  0x76   :  { %1166 = vmatprep.mubr.msk.bf16.mxu0 %vm436_vm0, %v1281_v54  ;;  %1182 = vmatprep.mubr.msk.bf16.mxu1 %vm436_vm0, %v1283_v55 }
  0x7d   :  { %654 = vmatmul.mubr.bf16.gmra.mrb[44].mxu0 %v1285_v56  ;;  %782 = vmatmul.mubr.bf16.gmra.mrb[44].mxu1 %v1286_v57 }
  0x7e   :  { %1167 = vmatprep.mubr.msk.bf16.mxu0 %vm436_vm0, %v1287_v58  ;;  %1183 = vmatprep.mubr.msk.bf16.mxu1 %vm436_vm0, %v1289_v59 }
  0x85   :  { %662 = vmatmul.mubr.bf16.gmra.mrb[48].mxu0 %v1291_v60  ;;  %790 = vmatmul.mubr.bf16.gmra.mrb[48].mxu1 %v1292_v61 }
  0x86   :  { %1168 = vmatprep.mubr.msk.bf16.mxu0 %vm436_vm0, %v1293_v62  ;;  %1184 = vmatprep.mubr.msk.bf16.mxu1 %vm436_vm0, %v1295_v63 }
  0x8d   :  { %670 = vmatmul.mubr.bf16.gmra.mrb[52].mxu0 %v1297_v0  ;;  %798 = vmatmul.mubr.bf16.gmra.mrb[52].mxu1 %v1298_v1 }
  0x8e   :  { %1169 = vmatprep.mubr.msk.bf16.mxu0 %vm436_vm0, %v1299_v2  ;;  %1185 = vmatprep.mubr.msk.bf16.mxu1 %vm436_vm0, %v1301_v3 }
  0x95   :  { %678 = vmatmul.mubr.bf16.gmra.mrb[56].mxu0 %v1303_v4  ;;  %806 = vmatmul.mubr.bf16.gmra.mrb[56].mxu1 %v1304_v5 }
  0x96   :  { %1170 = vmatprep.mubr.msk.bf16.mxu0 %vm436_vm0, %v1305_v6  ;;  %1186 = vmatprep.mubr.msk.bf16.mxu1 %vm436_vm0, %v1307_v7 }
  0x9d   :  { %686 = vmatmul.mubr.bf16.gmra.mrb[60].mxu0 %v1309_v8  ;;  %814 = vmatmul.mubr.bf16.gmra.mrb[60].mxu1 %v1310_v9 }
  0xf8   :  { %v567_v10 = vpop.f32.mrb[0].mxu0  ;;  %v695_v11 = vpop.f32.mrb[0].mxu1 }
  0xf9   :  { %vm822_vm1 = vcmp.ge.f32.partialorder %v567_v10, 0.0  ;;  %v886_v12 = vmul.f32 0.2, %v567_v10  ;;  %vm854_vm2 = vcmp.ge.f32.partialorder %v695_v11, 0.0  ;;  %v918_v13 = vmul.f32 0.2, %v695_v11 }
  0xfa   :  { %v569_v14 = vpop.f32.mrb[1].mxu0  ;;  %v697_v15 = vpop.f32.mrb[1].mxu1 }
  0xfb   :  { %v950_v16 = vsel %vm822_vm1, %v567_v10, %v886_v12  ;;  %v982_v17 = vsel %vm854_vm2, %v695_v11, %v918_v13  ;;  %v570_v18 = vpop.f32.mrb[2].mxu0  ;;  %v698_v19 = vpop.f32.mrb[2].mxu1 }
  0xfc   :  { %1014 = vst [vmem:[%s1772_s2] sm:$0xff] %v950_v16  ;;  %1046 = vst [vmem:[%s1772_s2 + $0x100] sm:$0xff] %v982_v17  ;;  %vm823_vm3 = vcmp.ge.f32.partialorder %v570_v18, 0.0  ;;  %v887_v20 = vmul.f32 0.2, %v570_v18  ;;  %vm855_vm4 = vcmp.ge.f32.partialorder %v698_v19, 0.0  ;;  %v572_v22 = vpop.f32.mrb[3].mxu0 }
  0xfd   :  { %v919_v21 = vmul.f32 0.2, %v698_v19  ;;  %v700_v23 = vpop.f32.mrb[3].mxu1 }
  0xfe   :  { %v951_v24 = vsel %vm823_vm3, %v570_v18, %v887_v20 }
  0xff   :  { %v983_v25 = vsel %vm855_vm4, %v698_v19, %v919_v21  ;;  %1015 = vst [vmem:[%s1772_s2 + $0x8] sm:$0xff] %v951_v24 }
 0x100   :  { %1047 = vst [vmem:[%s1772_s2 + $0x108] sm:$0xff] %v983_v25  ;;  %v575_v26 = vpop.f32.mrb[4].mxu0  ;;  %v703_v27 = vpop.f32.mrb[4].mxu1 }
 0x101   :  { %vm824_vm5 = vcmp.ge.f32.partialorder %v575_v26, 0.0  ;;  %v888_v28 = vmul.f32 0.2, %v575_v26  ;;  %vm856_vm6 = vcmp.ge.f32.partialorder %v703_v27, 0.0  ;;  %v920_v29 = vmul.f32 0.2, %v703_v27 }
 0x102   :  { %v577_v30 = vpop.f32.mrb[5].mxu0  ;;  %v705_v31 = vpop.f32.mrb[5].mxu1 }
 0x103   :  { %v952_v32 = vsel %vm824_vm5, %v575_v26, %v888_v28  ;;  %v984_v33 = vsel %vm856_vm6, %v703_v27, %v920_v29  ;;  %v578_v34 = vpop.f32.mrb[6].mxu0  ;;  %v706_v35 = vpop.f32.mrb[6].mxu1 }
 0x104   :  { %1016 = vst [vmem:[%s1772_s2 + $0x10] sm:$0xff] %v952_v32  ;;  %1048 = vst [vmem:[%s1772_s2 + $0x110] sm:$0xff] %v984_v33  ;;  %vm825_vm7 = vcmp.ge.f32.partialorder %v578_v34, 0.0  ;;  %v889_v36 = vmul.f32 0.2, %v578_v34  ;;  %vm857_vm8 = vcmp.ge.f32.partialorder %v706_v35, 0.0 }
 0x105   :  { %v921_v37 = vmul.f32 0.2, %v706_v35  ;;  %v580_v38 = vpop.f32.mrb[7].mxu0  ;;  %v708_v39 = vpop.f32.mrb[7].mxu1 }
 0x106   :  { %v953_v40 = vsel %vm825_vm7, %v578_v34, %v889_v36 }
 0x107   :  { %v985_v41 = vsel %vm857_vm8, %v706_v35, %v921_v37  ;;  %1017 = vst [vmem:[%s1772_s2 + $0x18] sm:$0xff] %v953_v40 }
 0x108   :  { %1049 = vst [vmem:[%s1772_s2 + $0x118] sm:$0xff] %v985_v41  ;;  %v583_v42 = vpop.f32.mrb[8].mxu0  ;;  %v711_v43 = vpop.f32.mrb[8].mxu1 }
 0x109   :  { %vm826_vm9 = vcmp.ge.f32.partialorder %v583_v42, 0.0  ;;  %v890_v44 = vmul.f32 0.2, %v583_v42  ;;  %vm858_vm10 = vcmp.ge.f32.partialorder %v711_v43, 0.0  ;;  %v922_v45 = vmul.f32 0.2, %v711_v43 }
 0x10a   :  { %v585_v46 = vpop.f32.mrb[9].mxu0  ;;  %v713_v47 = vpop.f32.mrb[9].mxu1 }
 0x10b   :  { %v954_v48 = vsel %vm826_vm9, %v583_v42, %v890_v44  ;;  %v986_v49 = vsel %vm858_vm10, %v711_v43, %v922_v45  ;;  %v586_v50 = vpop.f32.mrb[10].mxu0  ;;  %v714_v51 = vpop.f32.mrb[10].mxu1 }
 0x10c   :  { %1018 = vst [vmem:[%s1772_s2 + $0x20] sm:$0xff] %v954_v48  ;;  %1050 = vst [vmem:[%s1772_s2 + $0x120] sm:$0xff] %v986_v49  ;;  %vm827_vm11 = vcmp.ge.f32.partialorder %v586_v50, 0.0  ;;  %v891_v52 = vmul.f32 0.2, %v586_v50  ;;  %vm859_vm12 = vcmp.ge.f32.partialorder %v714_v51, 0.0 }
 0x10d   :  { %v923_v53 = vmul.f32 0.2, %v714_v51  ;;  %v588_v54 = vpop.f32.mrb[11].mxu0  ;;  %v716_v55 = vpop.f32.mrb[11].mxu1 }
 0x10e   :  { %v955_v56 = vsel %vm827_vm11, %v586_v50, %v891_v52 }
 0x10f   :  { %v987_v57 = vsel %vm859_vm12, %v714_v51, %v923_v53  ;;  %1019 = vst [vmem:[%s1772_s2 + $0x28] sm:$0xff] %v955_v56 }
 0x110   :  { %1051 = vst [vmem:[%s1772_s2 + $0x128] sm:$0xff] %v987_v57  ;;  %v591_v58 = vpop.f32.mrb[12].mxu0  ;;  %v719_v59 = vpop.f32.mrb[12].mxu1 }
 0x111   :  { %vm828_vm13 = vcmp.ge.f32.partialorder %v591_v58, 0.0  ;;  %v892_v60 = vmul.f32 0.2, %v591_v58  ;;  %vm860_vm14 = vcmp.ge.f32.partialorder %v719_v59, 0.0  ;;  %v924_v61 = vmul.f32 0.2, %v719_v59 }
 0x112   :  { %v593_v62 = vpop.f32.mrb[13].mxu0  ;;  %v721_v63 = vpop.f32.mrb[13].mxu1 }
 0x113   :  { %v956_v0 = vsel %vm828_vm13, %v591_v58, %v892_v60  ;;  %v988_v1 = vsel %vm860_vm14, %v719_v59, %v924_v61  ;;  %v594_v2 = vpop.f32.mrb[14].mxu0  ;;  %v722_v3 = vpop.f32.mrb[14].mxu1 }
 0x114   :  { %1020 = vst [vmem:[%s1772_s2 + $0x30] sm:$0xff] %v956_v0  ;;  %1052 = vst [vmem:[%s1772_s2 + $0x130] sm:$0xff] %v988_v1  ;;  %vm829_vm15 = vcmp.ge.f32.partialorder %v594_v2, 0.0  ;;  %v893_v4 = vmul.f32 0.2, %v594_v2  ;;  %vm861_vm0 = vcmp.ge.f32.partialorder %v722_v3, 0.0 }
 0x115   :  { %v925_v5 = vmul.f32 0.2, %v722_v3  ;;  %v596_v6 = vpop.f32.mrb[15].mxu0  ;;  %v724_v7 = vpop.f32.mrb[15].mxu1 }
 0x116   :  { %v957_v8 = vsel %vm829_vm15, %v594_v2, %v893_v4 }
 0x117   :  { %v989_v9 = vsel %vm861_vm0, %v722_v3, %v925_v5  ;;  %1021 = vst [vmem:[%s1772_s2 + $0x38] sm:$0xff] %v957_v8 }
 0x118   :  { %1053 = vst [vmem:[%s1772_s2 + $0x138] sm:$0xff] %v989_v9  ;;  %v599_v10 = vpop.f32.mrb[16].mxu0  ;;  %v727_v11 = vpop.f32.mrb[16].mxu1 }
 0x119   :  { %vm830_vm1 = vcmp.ge.f32.partialorder %v599_v10, 0.0  ;;  %v894_v12 = vmul.f32 0.2, %v599_v10  ;;  %vm862_vm2 = vcmp.ge.f32.partialorder %v727_v11, 0.0  ;;  %v926_v13 = vmul.f32 0.2, %v727_v11 }
 0x11a   :  { %v601_v14 = vpop.f32.mrb[17].mxu0  ;;  %v729_v15 = vpop.f32.mrb[17].mxu1 }
 0x11b   :  { %v958_v16 = vsel %vm830_vm1, %v599_v10, %v894_v12  ;;  %v990_v17 = vsel %vm862_vm2, %v727_v11, %v926_v13  ;;  %v602_v18 = vpop.f32.mrb[18].mxu0  ;;  %v730_v19 = vpop.f32.mrb[18].mxu1 }
 0x11c   :  { %1022 = vst [vmem:[%s1772_s2 + $0x40] sm:$0xff] %v958_v16  ;;  %1054 = vst [vmem:[%s1772_s2 + $0x140] sm:$0xff] %v990_v17  ;;  %vm831_vm3 = vcmp.ge.f32.partialorder %v602_v18, 0.0  ;;  %v895_v20 = vmul.f32 0.2, %v602_v18  ;;  %vm863_vm4 = vcmp.ge.f32.partialorder %v730_v19, 0.0 }
 0x11d   :  { %v927_v21 = vmul.f32 0.2, %v730_v19  ;;  %v604_v22 = vpop.f32.mrb[19].mxu0  ;;  %v732_v23 = vpop.f32.mrb[19].mxu1 }
 0x11e   :  { %v959_v24 = vsel %vm831_vm3, %v602_v18, %v895_v20 }
 0x11f   :  { %v991_v25 = vsel %vm863_vm4, %v730_v19, %v927_v21  ;;  %1023 = vst [vmem:[%s1772_s2 + $0x48] sm:$0xff] %v959_v24 }
 0x120   :  { %1055 = vst [vmem:[%s1772_s2 + $0x148] sm:$0xff] %v991_v25  ;;  %v607_v26 = vpop.f32.mrb[20].mxu0  ;;  %v735_v27 = vpop.f32.mrb[20].mxu1 }
 0x121   :  { %vm832_vm5 = vcmp.ge.f32.partialorder %v607_v26, 0.0  ;;  %v896_v28 = vmul.f32 0.2, %v607_v26  ;;  %vm864_vm6 = vcmp.ge.f32.partialorder %v735_v27, 0.0  ;;  %v928_v29 = vmul.f32 0.2, %v735_v27 }
 0x122   :  { %v609_v30 = vpop.f32.mrb[21].mxu0  ;;  %v737_v31 = vpop.f32.mrb[21].mxu1 }
 0x123   :  { %v960_v32 = vsel %vm832_vm5, %v607_v26, %v896_v28  ;;  %v992_v33 = vsel %vm864_vm6, %v735_v27, %v928_v29  ;;  %v610_v34 = vpop.f32.mrb[22].mxu0  ;;  %v738_v35 = vpop.f32.mrb[22].mxu1 }
 0x124   :  { %1024 = vst [vmem:[%s1772_s2 + $0x50] sm:$0xff] %v960_v32  ;;  %1056 = vst [vmem:[%s1772_s2 + $0x150] sm:$0xff] %v992_v33  ;;  %vm833_vm7 = vcmp.ge.f32.partialorder %v610_v34, 0.0  ;;  %v897_v36 = vmul.f32 0.2, %v610_v34  ;;  %vm865_vm8 = vcmp.ge.f32.partialorder %v738_v35, 0.0 }
 0x125   :  { %v929_v37 = vmul.f32 0.2, %v738_v35  ;;  %v612_v38 = vpop.f32.mrb[23].mxu0  ;;  %v740_v39 = vpop.f32.mrb[23].mxu1 }
 0x126   :  { %v961_v40 = vsel %vm833_vm7, %v610_v34, %v897_v36 }
 0x127   :  { %v993_v41 = vsel %vm865_vm8, %v738_v35, %v929_v37  ;;  %1025 = vst [vmem:[%s1772_s2 + $0x58] sm:$0xff] %v961_v40 }
 0x128   :  { %1057 = vst [vmem:[%s1772_s2 + $0x158] sm:$0xff] %v993_v41  ;;  %v615_v42 = vpop.f32.mrb[24].mxu0  ;;  %v743_v43 = vpop.f32.mrb[24].mxu1 }
 0x129   :  { %vm834_vm9 = vcmp.ge.f32.partialorder %v615_v42, 0.0  ;;  %v898_v44 = vmul.f32 0.2, %v615_v42  ;;  %vm866_vm10 = vcmp.ge.f32.partialorder %v743_v43, 0.0  ;;  %v930_v45 = vmul.f32 0.2, %v743_v43 }
 0x12a   :  { %v617_v46 = vpop.f32.mrb[25].mxu0  ;;  %v745_v47 = vpop.f32.mrb[25].mxu1 }
 0x12b   :  { %v962_v48 = vsel %vm834_vm9, %v615_v42, %v898_v44  ;;  %v994_v49 = vsel %vm866_vm10, %v743_v43, %v930_v45  ;;  %v618_v50 = vpop.f32.mrb[26].mxu0  ;;  %v746_v51 = vpop.f32.mrb[26].mxu1 }
 0x12c   :  { %1026 = vst [vmem:[%s1772_s2 + $0x60] sm:$0xff] %v962_v48  ;;  %1058 = vst [vmem:[%s1772_s2 + $0x160] sm:$0xff] %v994_v49  ;;  %vm835_vm11 = vcmp.ge.f32.partialorder %v618_v50, 0.0  ;;  %v899_v52 = vmul.f32 0.2, %v618_v50  ;;  %vm867_vm12 = vcmp.ge.f32.partialorder %v746_v51, 0.0 }
 0x12d   :  { %v931_v53 = vmul.f32 0.2, %v746_v51  ;;  %v620_v54 = vpop.f32.mrb[27].mxu0  ;;  %v748_v55 = vpop.f32.mrb[27].mxu1 }
 0x12e   :  { %v963_v56 = vsel %vm835_vm11, %v618_v50, %v899_v52 }
 0x12f   :  { %v995_v57 = vsel %vm867_vm12, %v746_v51, %v931_v53  ;;  %1027 = vst [vmem:[%s1772_s2 + $0x68] sm:$0xff] %v963_v56 }
 0x130   :  { %1059 = vst [vmem:[%s1772_s2 + $0x168] sm:$0xff] %v995_v57  ;;  %v623_v58 = vpop.f32.mrb[28].mxu0  ;;  %v751_v59 = vpop.f32.mrb[28].mxu1 }
 0x131   :  { %vm836_vm13 = vcmp.ge.f32.partialorder %v623_v58, 0.0  ;;  %v900_v60 = vmul.f32 0.2, %v623_v58  ;;  %vm868_vm14 = vcmp.ge.f32.partialorder %v751_v59, 0.0  ;;  %v932_v61 = vmul.f32 0.2, %v751_v59 }
 0x132   :  { %v625_v62 = vpop.f32.mrb[29].mxu0  ;;  %v753_v63 = vpop.f32.mrb[29].mxu1 }
 0x133   :  { %v964_v0 = vsel %vm836_vm13, %v623_v58, %v900_v60  ;;  %v996_v1 = vsel %vm868_vm14, %v751_v59, %v932_v61  ;;  %v626_v2 = vpop.f32.mrb[30].mxu0  ;;  %v754_v3 = vpop.f32.mrb[30].mxu1 }
 0x134   :  { %1028 = vst [vmem:[%s1772_s2 + $0x70] sm:$0xff] %v964_v0  ;;  %1060 = vst [vmem:[%s1772_s2 + $0x170] sm:$0xff] %v996_v1  ;;  %vm837_vm15 = vcmp.ge.f32.partialorder %v626_v2, 0.0  ;;  %v901_v4 = vmul.f32 0.2, %v626_v2  ;;  %vm869_vm0 = vcmp.ge.f32.partialorder %v754_v3, 0.0 }
 0x135   :  { %v933_v5 = vmul.f32 0.2, %v754_v3  ;;  %v628_v6 = vpop.f32.mrb[31].mxu0  ;;  %v756_v7 = vpop.f32.mrb[31].mxu1 }
 0x136   :  { %v965_v8 = vsel %vm837_vm15, %v626_v2, %v901_v4 }
 0x137   :  { %v997_v9 = vsel %vm869_vm0, %v754_v3, %v933_v5  ;;  %1029 = vst [vmem:[%s1772_s2 + $0x78] sm:$0xff] %v965_v8 }
 0x138   :  { %1061 = vst [vmem:[%s1772_s2 + $0x178] sm:$0xff] %v997_v9  ;;  %v631_v10 = vpop.f32.mrb[32].mxu0  ;;  %v759_v11 = vpop.f32.mrb[32].mxu1 }
 0x139   :  { %vm838_vm1 = vcmp.ge.f32.partialorder %v631_v10, 0.0  ;;  %v902_v12 = vmul.f32 0.2, %v631_v10  ;;  %vm870_vm2 = vcmp.ge.f32.partialorder %v759_v11, 0.0  ;;  %v934_v13 = vmul.f32 0.2, %v759_v11 }
 0x13a   :  { %v633_v14 = vpop.f32.mrb[33].mxu0  ;;  %v761_v15 = vpop.f32.mrb[33].mxu1 }
 0x13b   :  { %v966_v16 = vsel %vm838_vm1, %v631_v10, %v902_v12  ;;  %v998_v17 = vsel %vm870_vm2, %v759_v11, %v934_v13  ;;  %v634_v18 = vpop.f32.mrb[34].mxu0  ;;  %v762_v19 = vpop.f32.mrb[34].mxu1 }
 0x13c   :  { %1030 = vst [vmem:[%s1772_s2 + $0x80] sm:$0xff] %v966_v16  ;;  %1062 = vst [vmem:[%s1772_s2 + $0x180] sm:$0xff] %v998_v17  ;;  %vm839_vm3 = vcmp.ge.f32.partialorder %v634_v18, 0.0  ;;  %v903_v20 = vmul.f32 0.2, %v634_v18  ;;  %vm871_vm4 = vcmp.ge.f32.partialorder %v762_v19, 0.0 }
 0x13d   :  { %v935_v21 = vmul.f32 0.2, %v762_v19  ;;  %v636_v22 = vpop.f32.mrb[35].mxu0  ;;  %v764_v23 = vpop.f32.mrb[35].mxu1 }
 0x13e   :  { %v967_v24 = vsel %vm839_vm3, %v634_v18, %v903_v20 }
 0x13f   :  { %v999_v25 = vsel %vm871_vm4, %v762_v19, %v935_v21  ;;  %1031 = vst [vmem:[%s1772_s2 + $0x88] sm:$0xff] %v967_v24 }
 0x140   :  { %1063 = vst [vmem:[%s1772_s2 + $0x188] sm:$0xff] %v999_v25  ;;  %v639_v26 = vpop.f32.mrb[36].mxu0  ;;  %v767_v27 = vpop.f32.mrb[36].mxu1 }
 0x141   :  { %vm840_vm5 = vcmp.ge.f32.partialorder %v639_v26, 0.0  ;;  %v904_v28 = vmul.f32 0.2, %v639_v26  ;;  %vm872_vm6 = vcmp.ge.f32.partialorder %v767_v27, 0.0  ;;  %v936_v29 = vmul.f32 0.2, %v767_v27 }
 0x142   :  { %v641_v30 = vpop.f32.mrb[37].mxu0  ;;  %v769_v31 = vpop.f32.mrb[37].mxu1 }
 0x143   :  { %v968_v32 = vsel %vm840_vm5, %v639_v26, %v904_v28  ;;  %v1000_v33 = vsel %vm872_vm6, %v767_v27, %v936_v29  ;;  %v642_v34 = vpop.f32.mrb[38].mxu0  ;;  %v770_v35 = vpop.f32.mrb[38].mxu1 }
 0x144   :  { %1032 = vst [vmem:[%s1772_s2 + $0x90] sm:$0xff] %v968_v32  ;;  %1064 = vst [vmem:[%s1772_s2 + $0x190] sm:$0xff] %v1000_v33  ;;  %vm841_vm7 = vcmp.ge.f32.partialorder %v642_v34, 0.0  ;;  %v905_v36 = vmul.f32 0.2, %v642_v34  ;;  %vm873_vm8 = vcmp.ge.f32.partialorder %v770_v35, 0.0 }
 0x145   :  { %v937_v37 = vmul.f32 0.2, %v770_v35  ;;  %v644_v38 = vpop.f32.mrb[39].mxu0  ;;  %v772_v39 = vpop.f32.mrb[39].mxu1 }
 0x146   :  { %v969_v40 = vsel %vm841_vm7, %v642_v34, %v905_v36 }
 0x147   :  { %v1001_v41 = vsel %vm873_vm8, %v770_v35, %v937_v37  ;;  %1033 = vst [vmem:[%s1772_s2 + $0x98] sm:$0xff] %v969_v40 }
 0x148   :  { %1065 = vst [vmem:[%s1772_s2 + $0x198] sm:$0xff] %v1001_v41  ;;  %v647_v42 = vpop.f32.mrb[40].mxu0  ;;  %v775_v43 = vpop.f32.mrb[40].mxu1 }
 0x149   :  { %vm842_vm9 = vcmp.ge.f32.partialorder %v647_v42, 0.0  ;;  %v906_v44 = vmul.f32 0.2, %v647_v42  ;;  %vm874_vm10 = vcmp.ge.f32.partialorder %v775_v43, 0.0  ;;  %v938_v45 = vmul.f32 0.2, %v775_v43 }
 0x14a   :  { %v649_v46 = vpop.f32.mrb[41].mxu0  ;;  %v777_v47 = vpop.f32.mrb[41].mxu1 }
 0x14b   :  { %v970_v48 = vsel %vm842_vm9, %v647_v42, %v906_v44  ;;  %v1002_v49 = vsel %vm874_vm10, %v775_v43, %v938_v45  ;;  %v650_v50 = vpop.f32.mrb[42].mxu0  ;;  %v778_v51 = vpop.f32.mrb[42].mxu1 }
 0x14c   :  { %1034 = vst [vmem:[%s1772_s2 + $0xa0] sm:$0xff] %v970_v48  ;;  %1066 = vst [vmem:[%s1772_s2 + $0x1a0] sm:$0xff] %v1002_v49  ;;  %vm843_vm11 = vcmp.ge.f32.partialorder %v650_v50, 0.0  ;;  %v907_v52 = vmul.f32 0.2, %v650_v50  ;;  %vm875_vm12 = vcmp.ge.f32.partialorder %v778_v51, 0.0 }
 0x14d   :  { %v939_v53 = vmul.f32 0.2, %v778_v51  ;;  %v652_v54 = vpop.f32.mrb[43].mxu0  ;;  %v780_v55 = vpop.f32.mrb[43].mxu1 }
 0x14e   :  { %v971_v56 = vsel %vm843_vm11, %v650_v50, %v907_v52 }
 0x14f   :  { %v1003_v57 = vsel %vm875_vm12, %v778_v51, %v939_v53  ;;  %1035 = vst [vmem:[%s1772_s2 + $0xa8] sm:$0xff] %v971_v56 }
 0x150   :  { %1067 = vst [vmem:[%s1772_s2 + $0x1a8] sm:$0xff] %v1003_v57  ;;  %v655_v58 = vpop.f32.mrb[44].mxu0  ;;  %v783_v59 = vpop.f32.mrb[44].mxu1 }
 0x151   :  { %vm844_vm13 = vcmp.ge.f32.partialorder %v655_v58, 0.0  ;;  %v908_v60 = vmul.f32 0.2, %v655_v58  ;;  %vm876_vm14 = vcmp.ge.f32.partialorder %v783_v59, 0.0  ;;  %v940_v61 = vmul.f32 0.2, %v783_v59 }
 0x152   :  { %v657_v62 = vpop.f32.mrb[45].mxu0  ;;  %v785_v63 = vpop.f32.mrb[45].mxu1 }
 0x153   :  { %v972_v0 = vsel %vm844_vm13, %v655_v58, %v908_v60  ;;  %v1004_v1 = vsel %vm876_vm14, %v783_v59, %v940_v61  ;;  %v658_v2 = vpop.f32.mrb[46].mxu0  ;;  %v786_v3 = vpop.f32.mrb[46].mxu1 }
 0x154   :  { %1036 = vst [vmem:[%s1772_s2 + $0xb0] sm:$0xff] %v972_v0  ;;  %1068 = vst [vmem:[%s1772_s2 + $0x1b0] sm:$0xff] %v1004_v1  ;;  %vm845_vm15 = vcmp.ge.f32.partialorder %v658_v2, 0.0  ;;  %v909_v4 = vmul.f32 0.2, %v658_v2  ;;  %vm877_vm0 = vcmp.ge.f32.partialorder %v786_v3, 0.0 }
 0x155   :  { %v941_v5 = vmul.f32 0.2, %v786_v3  ;;  %v660_v6 = vpop.f32.mrb[47].mxu0  ;;  %v788_v7 = vpop.f32.mrb[47].mxu1 }
 0x156   :  { %v973_v8 = vsel %vm845_vm15, %v658_v2, %v909_v4 }
 0x157   :  { %v1005_v9 = vsel %vm877_vm0, %v786_v3, %v941_v5  ;;  %1037 = vst [vmem:[%s1772_s2 + $0xb8] sm:$0xff] %v973_v8 }
 0x158   :  { %1069 = vst [vmem:[%s1772_s2 + $0x1b8] sm:$0xff] %v1005_v9  ;;  %v663_v10 = vpop.f32.mrb[48].mxu0  ;;  %v791_v11 = vpop.f32.mrb[48].mxu1 }
 0x159   :  { %vm846_vm1 = vcmp.ge.f32.partialorder %v663_v10, 0.0  ;;  %v910_v12 = vmul.f32 0.2, %v663_v10  ;;  %vm878_vm2 = vcmp.ge.f32.partialorder %v791_v11, 0.0  ;;  %v942_v13 = vmul.f32 0.2, %v791_v11 }
 0x15a   :  { %v665_v14 = vpop.f32.mrb[49].mxu0  ;;  %v793_v15 = vpop.f32.mrb[49].mxu1 }
 0x15b   :  { %v974_v16 = vsel %vm846_vm1, %v663_v10, %v910_v12  ;;  %v1006_v17 = vsel %vm878_vm2, %v791_v11, %v942_v13  ;;  %v666_v18 = vpop.f32.mrb[50].mxu0  ;;  %v794_v19 = vpop.f32.mrb[50].mxu1 }
 0x15c   :  { %1038 = vst [vmem:[%s1772_s2 + $0xc0] sm:$0xff] %v974_v16  ;;  %1070 = vst [vmem:[%s1772_s2 + $0x1c0] sm:$0xff] %v1006_v17  ;;  %vm847_vm3 = vcmp.ge.f32.partialorder %v666_v18, 0.0  ;;  %v911_v20 = vmul.f32 0.2, %v666_v18  ;;  %vm879_vm4 = vcmp.ge.f32.partialorder %v794_v19, 0.0 }
 0x15d   :  { %v943_v21 = vmul.f32 0.2, %v794_v19  ;;  %v668_v22 = vpop.f32.mrb[51].mxu0  ;;  %v796_v23 = vpop.f32.mrb[51].mxu1 }
 0x15e   :  { %v975_v24 = vsel %vm847_vm3, %v666_v18, %v911_v20 }
 0x15f   :  { %v1007_v25 = vsel %vm879_vm4, %v794_v19, %v943_v21  ;;  %1039 = vst [vmem:[%s1772_s2 + $0xc8] sm:$0xff] %v975_v24 }
 0x160   :  { %1071 = vst [vmem:[%s1772_s2 + $0x1c8] sm:$0xff] %v1007_v25  ;;  %v671_v26 = vpop.f32.mrb[52].mxu0  ;;  %v799_v27 = vpop.f32.mrb[52].mxu1 }
 0x161   :  { %vm848_vm5 = vcmp.ge.f32.partialorder %v671_v26, 0.0  ;;  %v912_v28 = vmul.f32 0.2, %v671_v26  ;;  %vm880_vm6 = vcmp.ge.f32.partialorder %v799_v27, 0.0  ;;  %v944_v29 = vmul.f32 0.2, %v799_v27 }
 0x162   :  { %v673_v30 = vpop.f32.mrb[53].mxu0  ;;  %v801_v31 = vpop.f32.mrb[53].mxu1 }
 0x163   :  { %v976_v32 = vsel %vm848_vm5, %v671_v26, %v912_v28  ;;  %v1008_v33 = vsel %vm880_vm6, %v799_v27, %v944_v29  ;;  %v674_v34 = vpop.f32.mrb[54].mxu0  ;;  %v802_v35 = vpop.f32.mrb[54].mxu1 }
 0x164   :  { %1040 = vst [vmem:[%s1772_s2 + $0xd0] sm:$0xff] %v976_v32  ;;  %1072 = vst [vmem:[%s1772_s2 + $0x1d0] sm:$0xff] %v1008_v33  ;;  %vm849_vm7 = vcmp.ge.f32.partialorder %v674_v34, 0.0  ;;  %v913_v36 = vmul.f32 0.2, %v674_v34  ;;  %vm881_vm8 = vcmp.ge.f32.partialorder %v802_v35, 0.0 }
 0x165   :  { %v945_v37 = vmul.f32 0.2, %v802_v35  ;;  %v676_v38 = vpop.f32.mrb[55].mxu0  ;;  %v804_v39 = vpop.f32.mrb[55].mxu1 }
 0x166   :  { %v977_v40 = vsel %vm849_vm7, %v674_v34, %v913_v36 }
 0x167   :  { %v1009_v41 = vsel %vm881_vm8, %v802_v35, %v945_v37  ;;  %1041 = vst [vmem:[%s1772_s2 + $0xd8] sm:$0xff] %v977_v40 }
 0x168   :  { %1073 = vst [vmem:[%s1772_s2 + $0x1d8] sm:$0xff] %v1009_v41  ;;  %v679_v42 = vpop.f32.mrb[56].mxu0  ;;  %v807_v43 = vpop.f32.mrb[56].mxu1 }
 0x169   :  { %vm850_vm9 = vcmp.ge.f32.partialorder %v679_v42, 0.0  ;;  %v914_v44 = vmul.f32 0.2, %v679_v42  ;;  %vm882_vm10 = vcmp.ge.f32.partialorder %v807_v43, 0.0  ;;  %v946_v45 = vmul.f32 0.2, %v807_v43 }
 0x16a   :  { %v681_v46 = vpop.f32.mrb[57].mxu0  ;;  %v809_v47 = vpop.f32.mrb[57].mxu1 }
 0x16b   :  { %v978_v48 = vsel %vm850_vm9, %v679_v42, %v914_v44  ;;  %v1010_v49 = vsel %vm882_vm10, %v807_v43, %v946_v45  ;;  %v682_v50 = vpop.f32.mrb[58].mxu0  ;;  %v810_v51 = vpop.f32.mrb[58].mxu1 }
 0x16c   :  { %1042 = vst [vmem:[%s1772_s2 + $0xe0] sm:$0xff] %v978_v48  ;;  %1074 = vst [vmem:[%s1772_s2 + $0x1e0] sm:$0xff] %v1010_v49  ;;  %vm851_vm11 = vcmp.ge.f32.partialorder %v682_v50, 0.0  ;;  %v915_v52 = vmul.f32 0.2, %v682_v50  ;;  %vm883_vm12 = vcmp.ge.f32.partialorder %v810_v51, 0.0 }
 0x16d   :  { %v947_v53 = vmul.f32 0.2, %v810_v51  ;;  %v684_v54 = vpop.f32.mrb[59].mxu0  ;;  %v812_v55 = vpop.f32.mrb[59].mxu1 }
 0x16e   :  { %v979_v56 = vsel %vm851_vm11, %v682_v50, %v915_v52 }
 0x16f   :  { %v1011_v57 = vsel %vm883_vm12, %v810_v51, %v947_v53  ;;  %1043 = vst [vmem:[%s1772_s2 + $0xe8] sm:$0xff] %v979_v56 }
 0x170   :  { %1075 = vst [vmem:[%s1772_s2 + $0x1e8] sm:$0xff] %v1011_v57  ;;  %v687_v58 = vpop.f32.mrb[60].mxu0  ;;  %v815_v59 = vpop.f32.mrb[60].mxu1 }
 0x171   :  { %vm852_vm13 = vcmp.ge.f32.partialorder %v687_v58, 0.0  ;;  %v916_v60 = vmul.f32 0.2, %v687_v58  ;;  %vm884_vm14 = vcmp.ge.f32.partialorder %v815_v59, 0.0  ;;  %v948_v61 = vmul.f32 0.2, %v815_v59 }
 0x172   :  { %v689_v62 = vpop.f32.mrb[61].mxu0  ;;  %v817_v63 = vpop.f32.mrb[61].mxu1 }
 0x173   :  { %v980_v0 = vsel %vm852_vm13, %v687_v58, %v916_v60  ;;  %v1012_v1 = vsel %vm884_vm14, %v815_v59, %v948_v61  ;;  %v690_v2 = vpop.f32.mrb[62].mxu0  ;;  %v818_v3 = vpop.f32.mrb[62].mxu1 }
 0x174   :  { %1044 = vst [vmem:[%s1772_s2 + $0xf0] sm:$0xff] %v980_v0  ;;  %1076 = vst [vmem:[%s1772_s2 + $0x1f0] sm:$0xff] %v1012_v1  ;;  %vm853_vm15 = vcmp.ge.f32.partialorder %v690_v2, 0.0  ;;  %v917_v4 = vmul.f32 0.2, %v690_v2  ;;  %vm885_vm0 = vcmp.ge.f32.partialorder %v818_v3, 0.0 }
 0x175   :  { %v949_v5 = vmul.f32 0.2, %v818_v3  ;;  %v692_v6 = vpop.f32.mrb[63].mxu0  ;;  %v820_v7 = vpop.f32.mrb[63].mxu1 }
 0x176   :  { %v981_v8 = vsel %vm853_vm15, %v690_v2, %v917_v4 }
 0x177   :  { %v1013_v9 = vsel %vm885_vm0, %v818_v3, %v949_v5  ;;  %1045 = vst [vmem:[%s1772_s2 + $0xf8] sm:$0xff] %v981_v8 }
 0x178   :  { %1077 = vst [vmem:[%s1772_s2 + $0x1f8] sm:$0xff] %v1013_v9 }

// kernel: four_blocks_cnn.5
= control target key start
LH: loop header
LB: loop body
LE: loop exit
PB: predicated region body
PF: predicated region fallthrough
CT: control target
= control target key end

     0   :  { %s754_s1 = inlined_call_operand.vmem [shape: bf16[128,128], index: 1, kind: input, shape index: {}]   ;;  %s755_s0 = inlined_call_operand.vmem [shape: bf16[128,128], index: 0, kind: input, shape index: {}]   ;;  %s756_s2 = inlined_call_operand.vmem [shape: f32[128,128], index: 2, kind: output, shape index: {}]  }
   0x1   :  { %v499_v0 = vld [vmem:[%s754_s1] sm:$0xff]   ;;  %v500_v1 = vld [vmem:[%s754_s1 + $0x8] sm:$0xff]   ;;  %v501_v2 = vld [vmem:[%s754_s1 + $0x10] sm:$0xff]  }
   0x2   :  { %451 = vmatprep.subr.bf16.mxu0 %v499_v0  ;;  %483 = vmatprep.subr.bf16.mxu1 %v499_v0  ;;  %v502_v3 = vld [vmem:[%s754_s1 + $0x18] sm:$0xff]   ;;  %v507_v4 = vld [vmem:[%s755_s0] sm:$0xff]   ;;  %v504_v7 = vld [vmem:[%s754_s1 + $0x28] sm:$0xff]  }
   0x3   :  { %452 = vmatpush3.bf16.msra.mxu0 %v499_v0  ;;  %491 = vmatpush3.bf16.msra.mxu1 %v499_v0  ;;  %v508_v5 = vld [vmem:[%s755_s0 + $0x20] sm:$0xff]   ;;  %v505_v8 = vld [vmem:[%s754_s1 + $0x30] sm:$0xff]   ;;  %v506_v9 = vld [vmem:[%s754_s1 + $0x38] sm:$0xff]  }
   0x4   :  { %453 = vmatprep.subr.bf16.mxu0 %v500_v1  ;;  %484 = vmatprep.subr.bf16.mxu1 %v500_v1  ;;  %v503_v6 = vld [vmem:[%s754_s1 + $0x20] sm:$0xff]   ;;  %v509_v10 = vld [vmem:[%s755_s0 + $0x8] sm:$0xff]   ;;  %v511_v12 = vld [vmem:[%s755_s0 + $0x10] sm:$0xff]  }
   0x5   :  { %467 = vmatprep.mubr.bf16.mxu0 %v507_v4  ;;  %475 = vmatprep.mubr.bf16.mxu1 %v508_v5  ;;  %v510_v11 = vld [vmem:[%s755_s0 + $0x28] sm:$0xff]   ;;  %v512_v13 = vld [vmem:[%s755_s0 + $0x30] sm:$0xff]   ;;  %v513_v14 = vld [vmem:[%s755_s0 + $0x18] sm:$0xff]  }
   0x6   :  { %v514_v15 = vld [vmem:[%s755_s0 + $0x38] sm:$0xff]  }
   0x7   :  { %454 = vmatpush3.bf16.msra.mxu0 %v500_v1  ;;  %492 = vmatpush3.bf16.msra.mxu1 %v500_v1 }
   0x8   :  { %455 = vmatprep.subr.bf16.mxu0 %v501_v2  ;;  %485 = vmatprep.subr.bf16.mxu1 %v501_v2 }
   0xb   :  { %456 = vmatpush3.bf16.msra.mxu0 %v501_v2  ;;  %493 = vmatpush3.bf16.msra.mxu1 %v501_v2 }
   0xc   :  { %457 = vmatprep.subr.bf16.mxu0 %v502_v3  ;;  %486 = vmatprep.subr.bf16.mxu1 %v502_v3 }
   0xf   :  { %458 = vmatpush3.bf16.msra.mxu0 %v502_v3  ;;  %494 = vmatpush3.bf16.msra.mxu1 %v502_v3 }
  0x10   :  { %459 = vmatprep.subr.bf16.mxu0 %v503_v6  ;;  %487 = vmatprep.subr.bf16.mxu1 %v503_v6 }
  0x13   :  { %460 = vmatpush3.bf16.msra.mxu0 %v503_v6  ;;  %495 = vmatpush3.bf16.msra.mxu1 %v503_v6 }
  0x14   :  { %461 = vmatprep.subr.bf16.mxu0 %v504_v7  ;;  %488 = vmatprep.subr.bf16.mxu1 %v504_v7 }
  0x17   :  { %462 = vmatpush3.bf16.msra.mxu0 %v504_v7  ;;  %496 = vmatpush3.bf16.msra.mxu1 %v504_v7 }
  0x18   :  { %463 = vmatprep.subr.bf16.mxu0 %v505_v8  ;;  %489 = vmatprep.subr.bf16.mxu1 %v505_v8 }
  0x1b   :  { %464 = vmatpush3.bf16.msra.mxu0 %v505_v8  ;;  %497 = vmatpush3.bf16.msra.mxu1 %v505_v8 }
  0x1c   :  { %465 = vmatprep.subr.bf16.mxu0 %v506_v9  ;;  %490 = vmatprep.subr.bf16.mxu1 %v506_v9 }
  0x1f   :  { %466 = vmatpush3.bf16.msra.mxu0 %v506_v9  ;;  %498 = vmatpush3.bf16.msra.mxu1 %v506_v9 }
  0x22   :  { %468 = vmatmul.mubr.bf16.vlgmr.msra.gmra.mrb[0].mxu0 %v509_v10  ;;  %476 = vmatmul.mubr.bf16.vlgmr.msra.gmra.mrb[0].mxu1 %v510_v11 }
  0x23   :  { %471 = vmatprep.mubr.bf16.mxu0 %v511_v12  ;;  %479 = vmatprep.mubr.bf16.mxu1 %v512_v13 }
  0x2a   :  { %472 = vmatmul.mubr.bf16.gmra.mrb[4].mxu0 %v513_v14  ;;  %480 = vmatmul.mubr.bf16.gmra.mrb[4].mxu1 %v514_v15 }
  0xf5   :  { %v582_v16 = vpop.f32.mrb[0].mxu0  ;;  %v584_v17 = vpop.f32.mrb[0].mxu1 }
  0xf6   :  { %v586_v18 = vpop.f32.mrb[1].mxu0  ;;  %v588_v19 = vpop.f32.mrb[1].mxu1  ;;  %v265_v30 = vmul.f32 %v582_v16, %v582_v16  ;;  %v273_v31 = vmul.f32 %v584_v17, %v584_v17 }
  0xf7   :  { %v590_v20 = vpop.f32.mrb[2].mxu0  ;;  %v592_v21 = vpop.f32.mrb[2].mxu1  ;;  %v263_v22 = vmul.f32 %v586_v18, %v586_v18  ;;  %v271_v23 = vmul.f32 %v588_v19, %v588_v19 }
  0xf8   :  { %v598_v24 = vpop.f32.mrb[3].mxu0  ;;  %v600_v25 = vpop.f32.mrb[3].mxu1  ;;  %v266_v36 = vmul.f32 %v590_v20, %v590_v20  ;;  %v274_v43 = vmul.f32 %v592_v21, %v592_v21 }
  0xf9   :  { %v237_v26 = vadd.f32 %v598_v24, %v586_v18  ;;  %v264_v27 = vmul.f32 %v598_v24, %v598_v24  ;;  %v250_v28 = vadd.f32 %v600_v25, %v588_v19  ;;  %v272_v29 = vmul.f32 %v600_v25, %v600_v25 }
  0xfb   :  { %v238_v32 = vadd.f32 %v582_v16, %v237_v26  ;;  %v279_v33 = vadd.f32 %v264_v27, %v263_v22  ;;  %v251_v34 = vadd.f32 %v584_v17, %v250_v28  ;;  %v292_v35 = vadd.f32 %v272_v29, %v271_v23 }
  0xfd   :  { %v280_v37 = vadd.f32 %v279_v33, %v265_v30  ;;  %v293_v38 = vadd.f32 %v292_v35, %v273_v31  ;;  %v618_v39 = vpop.f32.mrb[4].mxu0  ;;  %v620_v40 = vpop.f32.mrb[4].mxu1  ;;  %v239_v41 = vadd.f32 %v590_v20, %v238_v32  ;;  %v252_v42 = vadd.f32 %v592_v21, %v251_v34 }
  0xfe   :  { %v626_v44 = vpop.f32.mrb[5].mxu0  ;;  %v628_v45 = vpop.f32.mrb[5].mxu1  ;;  %v269_v62 = vmul.f32 %v618_v39, %v618_v39  ;;  %v277_v2 = vmul.f32 %v620_v40, %v620_v40 }
  0xff   :  { %v240_v46 = vadd.f32 %v239_v41, %v626_v44  ;;  %v267_v47 = vmul.f32 %v626_v44, %v626_v44  ;;  %v281_v48 = vadd.f32 %v280_v37, %v266_v36  ;;  %v253_v49 = vadd.f32 %v252_v42, %v628_v45  ;;  %v634_v50 = vpop.f32.mrb[6].mxu0  ;;  %v636_v51 = vpop.f32.mrb[6].mxu1 }
 0x100   :  { %v275_v52 = vmul.f32 %v628_v45, %v628_v45  ;;  %v294_v53 = vadd.f32 %v293_v38, %v274_v43  ;;  %v640_v54 = vpop.f32.mrb[7].mxu0  ;;  %v642_v55 = vpop.f32.mrb[7].mxu1  ;;  %v270_v4 = vmul.f32 %v634_v50, %v634_v50  ;;  %v278_v8 = vmul.f32 %v636_v51, %v636_v51 }
 0x101   :  { %v282_v56 = vadd.f32 %v281_v48, %v267_v47  ;;  %v241_v57 = vadd.f32 %v240_v46, %v640_v54  ;;  %v268_v58 = vmul.f32 %v640_v54, %v640_v54  ;;  %v254_v59 = vadd.f32 %v253_v49, %v642_v55 }
 0x102   :  { %v295_v60 = vadd.f32 %v294_v53, %v275_v52  ;;  %v276_v61 = vmul.f32 %v642_v55, %v642_v55 }
 0x103   :  { %v242_v63 = vadd.f32 %v618_v39, %v241_v57  ;;  %v283_v0 = vadd.f32 %v282_v56, %v268_v58  ;;  %v255_v1 = vadd.f32 %v620_v40, %v254_v59 }
 0x104   :  { %v296_v3 = vadd.f32 %v295_v60, %v276_v61 }
 0x105   :  { %v243_v5 = vadd.f32 %v634_v50, %v242_v63  ;;  %v284_v6 = vadd.f32 %v283_v0, %v269_v62  ;;  %v256_v7 = vadd.f32 %v636_v51, %v255_v1 }
 0x106   :  { %v297_v9 = vadd.f32 %v296_v3, %v277_v2 }
 0x107   :  { %v244_v10 = vrot.slane %v243_v5, 4  ;;  %v285_v11 = vadd.f32 %v284_v6, %v270_v4  ;;  %v257_v12 = vrot.slane %v256_v7, 4 }
 0x108   :  { %v298_v13 = vadd.f32 %v297_v9, %v278_v8 }
 0x109   :  { %v245_v14 = vadd.f32 %v244_v10, %v243_v5  ;;  %v286_v15 = vrot.slane %v285_v11, 4  ;;  %v258_v22 = vadd.f32 %v257_v12, %v256_v7 }
 0x10a   :  { %v299_v23 = vrot.slane %v298_v13, 4 }
 0x10b   :  { %v246_v26 = vrot.slane %v245_v14, 2  ;;  %v287_v27 = vadd.f32 %v286_v15, %v285_v11  ;;  %v259_v28 = vrot.slane %v258_v22, 2 }
 0x10c   :  { %v300_v29 = vadd.f32 %v299_v23, %v298_v13 }
 0x10d   :  { %v247_v30 = vadd.f32 %v246_v26, %v245_v14  ;;  %v288_v31 = vrot.slane %v287_v27, 2  ;;  %v260_v32 = vadd.f32 %v259_v28, %v258_v22 }
 0x10e   :  { %v301_v33 = vrot.slane %v300_v29, 2 }
 0x10f   :  { %v248_v34 = vrot.slane %v247_v30, 1  ;;  %v289_v35 = vadd.f32 %v288_v31, %v287_v27  ;;  %v261_v36 = vrot.slane %v260_v32, 1 }
 0x110   :  { %v302_v37 = vadd.f32 %v301_v33, %v300_v29 }
 0x111   :  { %v249_v38 = vadd.f32 %v248_v34, %v247_v30  ;;  %v290_v41 = vrot.slane %v289_v35, 1  ;;  %v262_v42 = vadd.f32 %v261_v36, %v260_v32 }
 0x112   :  { %v303_v43 = vrot.slane %v302_v37, 1 }
 0x113   :  { %v291_v46 = vadd.f32 %v290_v41, %v289_v35  ;;  %v305_v47 = vmul.f32 0.015625, %v249_v38  ;;  %v662_v49 = vmul.f32 0.015625, %v262_v42 }
 0x114   :  { %v304_v48 = vadd.f32 %v303_v43, %v302_v37 }
 0x115   :  { %v307_v52 = vmul.f32 0.015625, %v291_v46  ;;  %v309_v53 = vmul.f32 %v305_v47, %v305_v47  ;;  %v315_v56 = vsub.f32 %v586_v18, %v305_v47  ;;  %v316_v57 = vsub.f32 %v598_v24, %v305_v47 }
 0x116   :  { %v317_v58 = vsub.f32 %v582_v16, %v305_v47  ;;  %v318_v59 = vsub.f32 %v590_v20, %v305_v47  ;;  %v319_v60 = vsub.f32 %v626_v44, %v305_v47  ;;  %v320_v61 = vsub.f32 %v640_v54, %v305_v47 }
 0x117   :  { %v311_v62 = vsub.f32 %v307_v52, %v309_v53  ;;  %v321_v63 = vsub.f32 %v618_v39, %v305_v47  ;;  %v322_v0 = vsub.f32 %v634_v50, %v305_v47  ;;  %v308_v1 = vmul.f32 0.015625, %v304_v48 }
 0x118   :  { %v310_v2 = vmul.f32 %v662_v49, %v662_v49  ;;  %v323_v18 = vsub.f32 %v588_v19, %v662_v49  ;;  %v324_v16 = vsub.f32 %v600_v25, %v662_v49  ;;  %v325_v20 = vsub.f32 %v584_v17, %v662_v49 }
 0x119   :  { %v313_v24 = vmax.f32 %v311_v62, 0.0  ;;  %v326_v44 = vsub.f32 %v592_v21, %v662_v49  ;;  %v327_v39 = vsub.f32 %v628_v45, %v662_v49  ;;  %v328_v50 = vsub.f32 %v642_v55, %v662_v49 }
 0x11a   :  { %v312_v54 = vsub.f32 %v308_v1, %v310_v2  ;;  %v329_v19 = vsub.f32 %v620_v40, %v662_v49  ;;  %v330_v25 = vsub.f32 %v636_v51, %v662_v49 }
 0x11b   :  { %v331_v3 = vadd.f32 1e-05, %v313_v24 }
 0x11c   :  { %v314_v4 = vmax.f32 %v312_v54, 0.0 }
 0x11d   :  { %515 = vrsqrt.f32 %v331_v3 }
 0x11e   :  { %v332_v17 = vadd.f32 1e-05, %v314_v4 }
 0x120   :  { %517 = vrsqrt.f32 %v332_v17 }
 0x127   :  { %v516_v5 = vpop.eup %515 }
 0x128   :  { %v335_v21 = vmul.f32 %v516_v5, %v315_v56  ;;  %v336_v6 = vmul.f32 %v516_v5, %v316_v57  ;;  %v337_v7 = vmul.f32 %v516_v5, %v317_v58  ;;  %v338_v45 = vmul.f32 %v516_v5, %v318_v59 }
 0x129   :  { %v339_v8 = vmul.f32 %v516_v5, %v319_v60  ;;  %v340_v9 = vmul.f32 %v516_v5, %v320_v61  ;;  %v341_v55 = vmul.f32 %v516_v5, %v321_v63  ;;  %v342_v10 = vmul.f32 %v516_v5, %v322_v0 }
 0x12a   :  { %v518_v11 = vpop.eup %517  ;;  %vm351_vm0 = vcmp.ge.f32.partialorder %v335_v21, 0.0  ;;  %vm352_vm1 = vcmp.ge.f32.partialorder %v336_v6, 0.0  ;;  %vm353_vm2 = vcmp.ge.f32.partialorder %v337_v7, 0.0  ;;  %vm354_vm3 = vcmp.ge.f32.partialorder %v338_v45, 0.0 }
 0x12b   :  { %vm355_vm4 = vcmp.ge.f32.partialorder %v339_v8, 0.0  ;;  %vm356_vm5 = vcmp.ge.f32.partialorder %v340_v9, 0.0  ;;  %vm357_vm6 = vcmp.ge.f32.partialorder %v341_v55, 0.0  ;;  %vm358_vm7 = vcmp.ge.f32.partialorder %v342_v10, 0.0 }
 0x12c   :  { %v367_v40 = vmul.f32 0.2, %v335_v21  ;;  %v368_v51 = vmul.f32 0.2, %v336_v6  ;;  %v369_v12 = vmul.f32 0.2, %v337_v7  ;;  %v343_v13 = vmul.f32 %v518_v11, %v323_v18 }
 0x12d   :  { %v370_v14 = vmul.f32 0.2, %v338_v45  ;;  %v371_v15 = vmul.f32 0.2, %v339_v8  ;;  %v372_v22 = vmul.f32 0.2, %v340_v9  ;;  %v344_v23 = vmul.f32 %v518_v11, %v324_v16 }
 0x12e   :  { %v373_v26 = vmul.f32 0.2, %v341_v55  ;;  %v374_v27 = vmul.f32 0.2, %v342_v10  ;;  %v383_v28 = vsel %vm351_vm0, %v335_v21, %v367_v40  ;;  %v384_v29 = vsel %vm352_vm1, %v336_v6, %v368_v51 }
 0x12f   :  { %v385_v30 = vsel %vm353_vm2, %v337_v7, %v369_v12  ;;  %v386_v31 = vsel %vm354_vm3, %v338_v45, %v370_v14  ;;  %v387_v32 = vsel %vm355_vm4, %v339_v8, %v371_v15  ;;  %v388_v33 = vsel %vm356_vm5, %v340_v9, %v372_v22  ;;  %399 = vst [vmem:[%s756_s2] sm:$0xff] %v383_v28 }
 0x130   :  { %400 = vst [vmem:[%s756_s2 + $0x8] sm:$0xff] %v384_v29  ;;  %v389_v34 = vsel %vm357_vm6, %v341_v55, %v373_v26  ;;  %v390_v35 = vsel %vm358_vm7, %v342_v10, %v374_v27  ;;  %401 = vst [vmem:[%s756_s2 + $0x10] sm:$0xff] %v385_v30  ;;  %v345_v36 = vmul.f32 %v518_v11, %v325_v20  ;;  %vm359_vm8 = vcmp.ge.f32.partialorder %v343_v13, 0.0 }
 0x131   :  { %402 = vst [vmem:[%s756_s2 + $0x18] sm:$0xff] %v386_v31  ;;  %403 = vst [vmem:[%s756_s2 + $0x20] sm:$0xff] %v387_v32  ;;  %v346_v37 = vmul.f32 %v518_v11, %v326_v44  ;;  %v347_v38 = vmul.f32 %v518_v11, %v327_v39  ;;  %v348_v41 = vmul.f32 %v518_v11, %v328_v50  ;;  %vm360_vm9 = vcmp.ge.f32.partialorder %v344_v23, 0.0 }
 0x132   :  { %404 = vst [vmem:[%s756_s2 + $0x28] sm:$0xff] %v388_v33  ;;  %405 = vst [vmem:[%s756_s2 + $0x30] sm:$0xff] %v389_v34  ;;  %v349_v42 = vmul.f32 %v518_v11, %v329_v19  ;;  %v350_v43 = vmul.f32 %v518_v11, %v330_v25  ;;  %vm361_vm10 = vcmp.ge.f32.partialorder %v345_v36, 0.0  ;;  %v375_v46 = vmul.f32 0.2, %v343_v13 }
 0x133   :  { %406 = vst [vmem:[%s756_s2 + $0x38] sm:$0xff] %v390_v35  ;;  %vm362_vm11 = vcmp.ge.f32.partialorder %v346_v37, 0.0  ;;  %vm363_vm12 = vcmp.ge.f32.partialorder %v347_v38, 0.0  ;;  %vm364_vm13 = vcmp.ge.f32.partialorder %v348_v41, 0.0  ;;  %v376_v47 = vmul.f32 0.2, %v344_v23 }
 0x134   :  { %vm365_vm14 = vcmp.ge.f32.partialorder %v349_v42, 0.0  ;;  %vm366_vm15 = vcmp.ge.f32.partialorder %v350_v43, 0.0  ;;  %v377_v48 = vmul.f32 0.2, %v345_v36  ;;  %v378_v49 = vmul.f32 0.2, %v346_v37 }
 0x135   :  { %v379_v52 = vmul.f32 0.2, %v347_v38  ;;  %v380_v53 = vmul.f32 0.2, %v348_v41  ;;  %v381_v56 = vmul.f32 0.2, %v349_v42  ;;  %v391_v58 = vsel %vm359_vm8, %v343_v13, %v375_v46 }
 0x136   :  { %v382_v57 = vmul.f32 0.2, %v350_v43  ;;  %v392_v59 = vsel %vm360_vm9, %v344_v23, %v376_v47  ;;  %v393_v60 = vsel %vm361_vm10, %v345_v36, %v377_v48  ;;  %v394_v61 = vsel %vm362_vm11, %v346_v37, %v378_v49  ;;  %407 = vst [vmem:[%s756_s2 + $0x40] sm:$0xff] %v391_v58 }
 0x137   :  { %v395_v62 = vsel %vm363_vm12, %v347_v38, %v379_v52  ;;  %v396_v63 = vsel %vm364_vm13, %v348_v41, %v380_v53  ;;  %408 = vst [vmem:[%s756_s2 + $0x48] sm:$0xff] %v392_v59  ;;  %v397_v0 = vsel %vm365_vm14, %v349_v42, %v381_v56  ;;  %409 = vst [vmem:[%s756_s2 + $0x50] sm:$0xff] %v393_v60 }
 0x138   :  { %v398_v1 = vsel %vm366_vm15, %v350_v43, %v382_v57  ;;  %410 = vst [vmem:[%s756_s2 + $0x58] sm:$0xff] %v394_v61  ;;  %411 = vst [vmem:[%s756_s2 + $0x60] sm:$0xff] %v395_v62 }
 0x139   :  { %412 = vst [vmem:[%s756_s2 + $0x68] sm:$0xff] %v396_v63  ;;  %413 = vst [vmem:[%s756_s2 + $0x70] sm:$0xff] %v397_v0 }
 0x13a   :  { %414 = vst [vmem:[%s756_s2 + $0x78] sm:$0xff] %v398_v1 }

// kernel: four_blocks_cnn.6
= control target key start
LH: loop header
LB: loop body
LE: loop exit
PB: predicated region body
PF: predicated region fallthrough
CT: control target
= control target key end

     0   :  { %s464_s1 = inlined_call_operand.vmem [shape: bf16[256,128], index: 1, kind: input, shape index: {}]   ;;  %s465_s0 = inlined_call_operand.vmem [shape: bf16[32,256], index: 0, kind: input, shape index: {}]   ;;  %s466_s2 = inlined_call_operand.vmem [shape: f32[32,128], index: 2, kind: output, shape index: {}]  }
   0x1   :  { %v351_v0 = vld [vmem:[%s464_s1 + $0x40] sm:$0xff]   ;;  %v353_v2 = vld [vmem:[%s464_s1 + $0x48] sm:$0xff]   ;;  %v355_v4 = vld [vmem:[%s464_s1 + $0x50] sm:$0xff]  }
   0x2   :  { %v352_v1 = vld [vmem:[%s464_s1] sm:$0xff]   ;;  %307 = vmatprep.subr.bf16.mxu0 %v351_v0  ;;  %335 = vmatprep.subr.bf16.mxu1 %v351_v0  ;;  %v354_v3 = vld [vmem:[%s464_s1 + $0x8] sm:$0xff]   ;;  %v356_v5 = vld [vmem:[%s464_s1 + $0x10] sm:$0xff]  }
   0x3   :  { %308 = vmatpush3.bf16.msra.mxu0 %v352_v1  ;;  %343 = vmatpush3.bf16.msra.mxu1 %v352_v1  ;;  %v357_v6 = vld [vmem:[%s464_s1 + $0x58] sm:$0xff]   ;;  %v359_v8 = vld [vmem:[%s464_s1 + $0x60] sm:$0xff]   ;;  %v361_v10 = vld [vmem:[%s464_s1 + $0x68] sm:$0xff]  }
   0x4   :  { %309 = vmatprep.subr.bf16.mxu0 %v353_v2  ;;  %336 = vmatprep.subr.bf16.mxu1 %v353_v2  ;;  %v358_v7 = vld [vmem:[%s464_s1 + $0x18] sm:$0xff]   ;;  %v360_v9 = vld [vmem:[%s464_s1 + $0x20] sm:$0xff]   ;;  %v362_v13 = vld [vmem:[%s464_s1 + $0x28] sm:$0xff]  }
   0x5   :  { %v369_v11 = vld [vmem:[%s465_s0 + $0x4] ss:$8 sps:$4 sm:$0xff]   ;;  %v372_v12 = vld [vmem:[%s465_s0 + $0x14] ss:$8 sps:$4 sm:$0xff]   ;;  %v367_v18 = vld [vmem:[%s465_s0] ss:$8 sps:$4 sm:$0xff]  }
   0x6   :  { %v363_v14 = vld [vmem:[%s464_s1 + $0x70] sm:$0xff]   ;;  %196 = vmatprep.mubr.bf16.mxu0 %v369_v11  ;;  %204 = vmatprep.mubr.bf16.mxu1 %v372_v12  ;;  %v365_v16 = vld [vmem:[%s464_s1 + $0x78] sm:$0xff]  }
   0x7   :  { %310 = vmatpush3.bf16.msra.mxu0 %v354_v3  ;;  %344 = vmatpush3.bf16.msra.mxu1 %v354_v3  ;;  %v364_v15 = vld [vmem:[%s464_s1 + $0x30] sm:$0xff]   ;;  %v366_v17 = vld [vmem:[%s464_s1 + $0x38] sm:$0xff]  }
   0x8   :  { %311 = vmatprep.subr.bf16.mxu0 %v355_v4  ;;  %337 = vmatprep.subr.bf16.mxu1 %v355_v4  ;;  %v370_v19 = vld [vmem:[%s465_s0 + $0x10] ss:$8 sps:$4 sm:$0xff]  }
   0xb   :  { %312 = vmatpush3.bf16.msra.mxu0 %v356_v5  ;;  %345 = vmatpush3.bf16.msra.mxu1 %v356_v5 }
   0xc   :  { %313 = vmatprep.subr.bf16.mxu0 %v357_v6  ;;  %338 = vmatprep.subr.bf16.mxu1 %v357_v6 }
   0xf   :  { %314 = vmatpush3.bf16.msra.mxu0 %v358_v7  ;;  %346 = vmatpush3.bf16.msra.mxu1 %v358_v7 }
  0x10   :  { %315 = vmatprep.subr.bf16.mxu0 %v359_v8  ;;  %339 = vmatprep.subr.bf16.mxu1 %v359_v8 }
  0x13   :  { %316 = vmatpush3.bf16.msra.mxu0 %v360_v9  ;;  %347 = vmatpush3.bf16.msra.mxu1 %v360_v9 }
  0x14   :  { %317 = vmatprep.subr.bf16.mxu0 %v361_v10  ;;  %340 = vmatprep.subr.bf16.mxu1 %v361_v10 }
  0x17   :  { %318 = vmatpush3.bf16.msra.mxu0 %v362_v13  ;;  %348 = vmatpush3.bf16.msra.mxu1 %v362_v13 }
  0x18   :  { %319 = vmatprep.subr.bf16.mxu0 %v363_v14  ;;  %341 = vmatprep.subr.bf16.mxu1 %v363_v14 }
  0x1b   :  { %320 = vmatpush3.bf16.msra.mxu0 %v364_v15  ;;  %349 = vmatpush3.bf16.msra.mxu1 %v364_v15 }
  0x1c   :  { %321 = vmatprep.subr.bf16.mxu0 %v365_v16  ;;  %342 = vmatprep.subr.bf16.mxu1 %v365_v16 }
  0x1f   :  { %322 = vmatpush3.bf16.msra.mxu0 %v366_v17  ;;  %350 = vmatpush3.bf16.msra.mxu1 %v366_v17 }
  0x22   :  { %197 = vmatmul.mubr.bf16.vlgmr.msra.gmra.mrb[0].mxu0 %v367_v18  ;;  %205 = vmatmul.mubr.bf16.vlgmr.msra.gmra.mrb[0].mxu1 %v370_v19 }
  0xf5   :  { %v323_v20 = vpop.f32.mrb[0].mxu0  ;;  %v329_v21 = vpop.f32.mrb[0].mxu1 }
  0xf6   :  { %v324_v22 = vpop.f32.mrb[1].mxu0  ;;  %v330_v23 = vpop.f32.mrb[1].mxu1 }
  0xf7   :  { %v325_v24 = vadd.f32 %v324_v22, %v323_v20  ;;  %v331_v25 = vadd.f32 %v330_v23, %v329_v21  ;;  %v326_v26 = vpop.f32.mrb[2].mxu0  ;;  %v332_v27 = vpop.f32.mrb[2].mxu1 }
  0xf8   :  { %v327_v28 = vpop.f32.mrb[3].mxu0  ;;  %v333_v29 = vpop.f32.mrb[3].mxu1 }
  0xf9   :  { %v328_v30 = vadd.f32 %v327_v28, %v326_v26  ;;  %v334_v31 = vadd.f32 %v333_v29, %v332_v27  ;;  %v227_v32 = vmul.f32 %v325_v24, %v325_v24  ;;  %v229_v33 = vmul.f32 %v331_v25, %v331_v25 }
  0xfb   :  { %v213_v34 = vadd.f32 %v328_v30, %v325_v24  ;;  %v228_v35 = vmul.f32 %v328_v30, %v328_v30  ;;  %v220_v36 = vadd.f32 %v334_v31, %v331_v25  ;;  %v230_v37 = vmul.f32 %v334_v31, %v334_v31 }
  0xfd   :  { %v214_v38 = vrot.slane %v213_v34, 4  ;;  %v231_v39 = vadd.f32 %v228_v35, %v227_v32  ;;  %v221_v40 = vrot.slane %v220_v36, 4  ;;  %v238_v41 = vadd.f32 %v230_v37, %v229_v33 }
  0xff   :  { %v215_v42 = vadd.f32 %v214_v38, %v213_v34  ;;  %v232_v43 = vrot.slane %v231_v39, 4  ;;  %v222_v44 = vadd.f32 %v221_v40, %v220_v36  ;;  %v239_v45 = vrot.slane %v238_v41, 4 }
 0x101   :  { %v216_v46 = vrot.slane %v215_v42, 2  ;;  %v233_v47 = vadd.f32 %v232_v43, %v231_v39  ;;  %v223_v48 = vrot.slane %v222_v44, 2  ;;  %v240_v49 = vadd.f32 %v239_v45, %v238_v41 }
 0x103   :  { %v217_v50 = vadd.f32 %v216_v46, %v215_v42  ;;  %v234_v51 = vrot.slane %v233_v47, 2  ;;  %v224_v52 = vadd.f32 %v223_v48, %v222_v44  ;;  %v241_v53 = vrot.slane %v240_v49, 2 }
 0x105   :  { %v218_v54 = vrot.slane %v217_v50, 1  ;;  %v235_v55 = vadd.f32 %v234_v51, %v233_v47  ;;  %v225_v56 = vrot.slane %v224_v52, 1  ;;  %v242_v57 = vadd.f32 %v241_v53, %v240_v49 }
 0x107   :  { %v219_v58 = vadd.f32 %v218_v54, %v217_v50  ;;  %v236_v59 = vrot.slane %v235_v55, 1  ;;  %v226_v60 = vadd.f32 %v225_v56, %v224_v52  ;;  %v243_v61 = vrot.slane %v242_v57, 1 }
 0x109   :  { %v237_v62 = vadd.f32 %v236_v59, %v235_v55  ;;  %v245_v63 = vmul.f32 0.0625, %v219_v58  ;;  %v244_v0 = vadd.f32 %v243_v61, %v242_v57  ;;  %v246_v1 = vmul.f32 0.0625, %v226_v60 }
 0x10b   :  { %v247_v2 = vmul.f32 0.0625, %v237_v62  ;;  %v249_v3 = vmul.f32 %v245_v63, %v245_v63  ;;  %v255_v4 = vsub.f32 %v325_v24, %v245_v63  ;;  %v256_v5 = vsub.f32 %v328_v30, %v245_v63 }
 0x10c   :  { %v248_v6 = vmul.f32 0.0625, %v244_v0  ;;  %v250_v7 = vmul.f32 %v246_v1, %v246_v1  ;;  %v257_v8 = vsub.f32 %v331_v25, %v246_v1  ;;  %v258_v9 = vsub.f32 %v334_v31, %v246_v1 }
 0x10d   :  { %v251_v10 = vsub.f32 %v247_v2, %v249_v3 }
 0x10e   :  { %v252_v11 = vsub.f32 %v248_v6, %v250_v7 }
 0x10f   :  { %v253_v12 = vmax.f32 %v251_v10, 0.0 }
 0x110   :  { %v254_v13 = vmax.f32 %v252_v11, 0.0 }
 0x111   :  { %v259_v14 = vadd.f32 1e-05, %v253_v12 }
 0x112   :  { %v260_v15 = vadd.f32 1e-05, %v254_v13 }
 0x113   :  { %373 = vrsqrt.f32 %v259_v14 }
 0x114   :  { %375 = vrsqrt.f32 %v260_v15 }
 0x11d   :  { %v374_v16 = vpop.eup %373 }
 0x11e   :  { %v376_v17 = vpop.eup %375  ;;  %v263_v18 = vmul.f32 %v374_v16, %v255_v4  ;;  %v264_v19 = vmul.f32 %v374_v16, %v256_v5 }
 0x11f   :  { %v265_v20 = vmul.f32 %v376_v17, %v257_v8  ;;  %v266_v21 = vmul.f32 %v376_v17, %v258_v9 }
 0x120   :  { %vm267_vm0 = vcmp.ge.f32.partialorder %v263_v18, 0.0  ;;  %vm268_vm1 = vcmp.ge.f32.partialorder %v264_v19, 0.0  ;;  %v271_v22 = vmul.f32 0.2, %v263_v18  ;;  %v272_v23 = vmul.f32 0.2, %v264_v19 }
 0x121   :  { %vm269_vm2 = vcmp.ge.f32.partialorder %v265_v20, 0.0  ;;  %vm270_vm3 = vcmp.ge.f32.partialorder %v266_v21, 0.0  ;;  %v273_v24 = vmul.f32 0.2, %v265_v20  ;;  %v274_v25 = vmul.f32 0.2, %v266_v21 }
 0x122   :  { %v275_v26 = vsel %vm267_vm0, %v263_v18, %v271_v22  ;;  %v276_v27 = vsel %vm268_vm1, %v264_v19, %v272_v23 }
 0x123   :  { %279 = vst [vmem:[%s466_s2] sm:$0xff] %v275_v26  ;;  %280 = vst [vmem:[%s466_s2 + $0x8] sm:$0xff] %v276_v27  ;;  %v277_v28 = vsel %vm269_vm2, %v265_v20, %v273_v24  ;;  %v278_v29 = vsel %vm270_vm3, %v266_v21, %v274_v25 }
 0x124   :  { %281 = vst [vmem:[%s466_s2 + $0x10] sm:$0xff] %v277_v28  ;;  %282 = vst [vmem:[%s466_s2 + $0x18] sm:$0xff] %v278_v29 }

// kernel: four_blocks_cnn.7
= control target key start
LH: loop header
LB: loop body
LE: loop exit
PB: predicated region body
PF: predicated region fallthrough
CT: control target
= control target key end

     0   :  { %s387_s1 = inlined_call_operand.vmem [shape: bf16[256,128], index: 1, kind: input, shape index: {}]   ;;  %s388_s0 = inlined_call_operand.vmem [shape: bf16[16,256], index: 0, kind: input, shape index: {}]   ;;  %s389_s2 = inlined_call_operand.vmem [shape: f32[16,128], index: 2, kind: output, shape index: {}]  }
   0x1   :  { %v289_v0 = vld [vmem:[%s387_s1 + $0x40] sm:$0xff]   ;;  %v291_v2 = vld [vmem:[%s387_s1 + $0x48] sm:$0xff]   ;;  %v293_v4 = vld [vmem:[%s387_s1 + $0x50] sm:$0xff]  }
   0x2   :  { %v290_v1 = vld [vmem:[%s387_s1] sm:$0xff]   ;;  %267 = vmatprep.subr.bf16.mxu0 %v289_v0  ;;  %v292_v3 = vld [vmem:[%s387_s1 + $0x8] sm:$0xff]   ;;  %v294_v5 = vld [vmem:[%s387_s1 + $0x10] sm:$0xff]  }
   0x3   :  { %268 = vmatpush3.bf16.msra.mxu0 %v290_v1  ;;  %v295_v6 = vld [vmem:[%s387_s1 + $0x58] sm:$0xff]   ;;  %v297_v8 = vld [vmem:[%s387_s1 + $0x60] sm:$0xff]   ;;  %v299_v10 = vld [vmem:[%s387_s1 + $0x68] sm:$0xff]  }
   0x4   :  { %269 = vmatprep.subr.bf16.mxu0 %v291_v2  ;;  %v296_v7 = vld [vmem:[%s387_s1 + $0x18] sm:$0xff]   ;;  %v298_v9 = vld [vmem:[%s387_s1 + $0x20] sm:$0xff]   ;;  %v300_v12 = vld [vmem:[%s387_s1 + $0x28] sm:$0xff]  }
   0x5   :  { %v307_v11 = vld [vmem:[%s388_s0 + $0x4] ss:$8 sps:$4 sm:$0xff]   ;;  %v301_v13 = vld [vmem:[%s387_s1 + $0x70] sm:$0xff]   ;;  %v303_v15 = vld [vmem:[%s387_s1 + $0x78] sm:$0xff]  }
   0x6   :  { %184 = vmatprep.mubr.bf16.mxu0 %v307_v11  ;;  %v302_v14 = vld [vmem:[%s387_s1 + $0x30] sm:$0xff]   ;;  %v304_v16 = vld [vmem:[%s387_s1 + $0x38] sm:$0xff]   ;;  %v305_v17 = vld [vmem:[%s388_s0] ss:$8 sps:$4 sm:$0xff]  }
   0x7   :  { %270 = vmatpush3.bf16.msra.mxu0 %v292_v3 }
   0x8   :  { %271 = vmatprep.subr.bf16.mxu0 %v293_v4 }
   0xb   :  { %272 = vmatpush3.bf16.msra.mxu0 %v294_v5 }
   0xc   :  { %273 = vmatprep.subr.bf16.mxu0 %v295_v6 }
   0xf   :  { %274 = vmatpush3.bf16.msra.mxu0 %v296_v7 }
  0x10   :  { %275 = vmatprep.subr.bf16.mxu0 %v297_v8 }
  0x13   :  { %276 = vmatpush3.bf16.msra.mxu0 %v298_v9 }
  0x14   :  { %277 = vmatprep.subr.bf16.mxu0 %v299_v10 }
  0x17   :  { %278 = vmatpush3.bf16.msra.mxu0 %v300_v12 }
  0x18   :  { %279 = vmatprep.subr.bf16.mxu0 %v301_v13 }
  0x1b   :  { %280 = vmatpush3.bf16.msra.mxu0 %v302_v14 }
  0x1c   :  { %281 = vmatprep.subr.bf16.mxu0 %v303_v15 }
  0x1f   :  { %282 = vmatpush3.bf16.msra.mxu0 %v304_v16 }
  0x22   :  { %185 = vmatmul.mubr.bf16.vlgmr.msra.gmra.mrb[0].mxu0 %v305_v17 }
  0xf5   :  { %v283_v18 = vpop.f32.mrb[0].mxu0 }
  0xf6   :  { %v284_v19 = vpop.f32.mrb[1].mxu0 }
  0xf7   :  { %v285_v20 = vadd.f32 %v284_v19, %v283_v18  ;;  %v286_v21 = vpop.f32.mrb[2].mxu0 }
  0xf8   :  { %v287_v22 = vpop.f32.mrb[3].mxu0 }
  0xf9   :  { %v193_v23 = vrot.slane %v285_v20, 4  ;;  %v205_v24 = vmul.f32 %v285_v20, %v285_v20  ;;  %v288_v25 = vadd.f32 %v287_v22, %v286_v21 }
  0xfb   :  { %v194_v26 = vadd.f32 %v285_v20, %v193_v23  ;;  %v207_v27 = vrot.slane %v205_v24, 4  ;;  %v199_v28 = vrot.slane %v288_v25, 4  ;;  %v206_v29 = vmul.f32 %v288_v25, %v288_v25 }
  0xfd   :  { %v195_v30 = vrot.slane %v194_v26, 2  ;;  %v208_v31 = vadd.f32 %v207_v27, %v205_v24  ;;  %v200_v32 = vadd.f32 %v288_v25, %v199_v28  ;;  %v213_v33 = vrot.slane %v206_v29, 4 }
  0xff   :  { %v196_v34 = vadd.f32 %v195_v30, %v194_v26  ;;  %v209_v35 = vrot.slane %v208_v31, 2  ;;  %v201_v36 = vrot.slane %v200_v32, 2  ;;  %v214_v37 = vadd.f32 %v213_v33, %v206_v29 }
 0x101   :  { %v197_v38 = vrot.slane %v196_v34, 1  ;;  %v210_v39 = vadd.f32 %v209_v35, %v208_v31  ;;  %v202_v40 = vadd.f32 %v201_v36, %v200_v32  ;;  %v215_v41 = vrot.slane %v214_v37, 2 }
 0x103   :  { %v198_v42 = vadd.f32 %v197_v38, %v196_v34  ;;  %v211_v43 = vrot.slane %v210_v39, 1  ;;  %v203_v44 = vrot.slane %v202_v40, 1  ;;  %v216_v45 = vadd.f32 %v215_v41, %v214_v37 }
 0x105   :  { %v212_v46 = vadd.f32 %v211_v43, %v210_v39  ;;  %v219_v47 = vmul.f32 0.25, %v198_v42  ;;  %v204_v48 = vadd.f32 %v203_v44, %v202_v40  ;;  %v217_v49 = vrot.slane %v216_v45, 1 }
 0x107   :  { %v221_v50 = vmul.f32 0.25, %v212_v46  ;;  %v223_v51 = vmul.f32 %v219_v47, %v219_v47  ;;  %v218_v52 = vadd.f32 %v217_v49, %v216_v45  ;;  %v220_v53 = vmul.f32 0.25, %v204_v48 }
 0x108   :  { %v229_v62 = vsub.f32 %v285_v20, %v219_v47 }
 0x109   :  { %v225_v54 = vsub.f32 %v221_v50, %v223_v51  ;;  %v222_v55 = vmul.f32 0.25, %v218_v52  ;;  %v224_v56 = vmul.f32 %v220_v53, %v220_v53  ;;  %v230_v1 = vsub.f32 %v288_v25, %v220_v53 }
 0x10b   :  { %v227_v57 = vmax.f32 %v225_v54, 0.0  ;;  %v226_v58 = vsub.f32 %v222_v55, %v224_v56 }
 0x10d   :  { %v231_v59 = vadd.f32 1e-05, %v227_v57  ;;  %v228_v60 = vmax.f32 %v226_v58, 0.0 }
 0x10f   :  { %308 = vrsqrt.f32 %v231_v59  ;;  %v232_v61 = vadd.f32 1e-05, %v228_v60 }
 0x111   :  { %310 = vrsqrt.f32 %v232_v61 }
 0x119   :  { %v309_v63 = vpop.eup %308 }
 0x11a   :  { %v235_v0 = vmul.f32 %v309_v63, %v229_v62 }
 0x11b   :  { %v311_v2 = vpop.eup %310 }
 0x11c   :  { %vm237_vm0 = vcmp.ge.f32.partialorder %v235_v0, 0.0  ;;  %v239_v3 = vmul.f32 0.2, %v235_v0  ;;  %v236_v4 = vmul.f32 %v311_v2, %v230_v1 }
 0x11e   :  { %v241_v5 = vsel %vm237_vm0, %v235_v0, %v239_v3  ;;  %vm238_vm1 = vcmp.ge.f32.partialorder %v236_v4, 0.0  ;;  %v240_v6 = vmul.f32 0.2, %v236_v4 }
 0x11f   :  { %243 = vst [vmem:[%s389_s2] sm:$0xff] %v241_v5 }
 0x120   :  { %v242_v7 = vsel %vm238_vm1, %v236_v4, %v240_v6 }
 0x121   :  { %244 = vst [vmem:[%s389_s2 + $0x8] sm:$0xff] %v242_v7 }

</bundles_post_ra>
